<compile_context>
chip_gen: v5e
topology: v5e:2x2
jax: 0.10.0
libtpu: 0.0.40
codegen_flags: <defaults>
</compile_context>

<pallas_src>
import functools

import jax
import jax.numpy as jnp
from jax.experimental import pallas as pl
from jax.experimental.pallas import tpu as pltpu


def _head_kernel(x_ref, w_ref, b_ref, o_ref, acc_ref, *, inv_hw):
    """One (batch-tile, channel-tile) step of avg_pool + fc + l2_norm.

    x_ref   : (TM, HW, TK) f32  post-layer4 features, channels on lanes
    w_ref   : (TK, N_OUT)  f32  fc weight slice (pre-transposed to K x N_out)
    b_ref   : (1, N_OUT)   f32  fc bias
    o_ref   : (TM, N_OUT)       output block (written on the last K step)
    acc_ref : (TM, N_OUT)  f32  VMEM accumulator, persistent across K steps
    """
    k = pl.program_id(1)

    @pl.when(k == 0)
    def _():
        acc_ref[...] = jnp.zeros_like(acc_ref)

    # Global average pool over the spatial (sublane) axis of this channel tile.
    pooled = jnp.sum(x_ref[...], axis=1) * inv_hw                # (TM, TK)

    # Partial fc contraction on the MXU, f32 accumulation.
    acc_ref[...] += jnp.dot(pooled, w_ref[...],
                            preferred_element_type=jnp.float32)

    @pl.when(k == pl.num_programs(1) - 1)
    def _():
        y = acc_ref[...] + b_ref[...]                            # (TM, N_OUT)
        inv_norm = jax.lax.rsqrt(jnp.sum(y * y, axis=1, keepdims=True))
        o_ref[...] = (y * inv_norm).astype(o_ref.dtype)


def se_resnext50_head(feat_nchw, fc_w, fc_b, *, tk=512):
    """Fused avg_pool + flatten + fc + l2_norm.

    feat_nchw : (N, C_in, H, W) f32 output of backbone.layer4
    fc_w      : (C_out, C_in)   f32 PyTorch Linear weight (out, in)
    fc_b      : (C_out,)        f32 PyTorch Linear bias
    returns   : (N, C_out)      f32 l2-normalized embedding
    """
    n, c_in, h, w = feat_nchw.shape
    c_out = fc_w.shape[0]
    hw = h * w
    assert c_in % tk == 0, "channel dim must be divisible by the K tile"

    # Lane-dense layout: channels on lanes, spatial on sublanes.
    feat = jnp.transpose(feat_nchw.reshape(n, c_in, hw), (0, 2, 1))  # (N, HW, C)

    # Pad the batch to a sublane/tile friendly size.
    if n <= 128:
        tm = max(8, ((n + 7) // 8) * 8)
        n_pad = tm
    else:
        tm = 128
        n_pad = ((n + 127) // 128) * 128
    if n_pad != n:
        feat = jnp.pad(feat, ((0, n_pad - n), (0, 0), (0, 0)))

    w_t = fc_w.T.astype(jnp.float32)              # (C_in, C_out)
    b2 = fc_b.reshape(1, c_out).astype(jnp.float32)

    grid = (n_pad // tm, c_in // tk)
    kernel = functools.partial(_head_kernel, inv_hw=1.0 / float(hw))

    out = pl.pallas_call(
        kernel,
        out_shape=jax.ShapeDtypeStruct((n_pad, c_out), jnp.float32),
        grid_spec=pltpu.PrefetchScalarGridSpec(
            num_scalar_prefetch=0,
            grid=grid,
            in_specs=[
                pl.BlockSpec((tm, hw, tk), lambda i, k: (i, 0, k)),  # features
                pl.BlockSpec((tk, c_out), lambda i, k: (k, 0)),      # fc weight
                pl.BlockSpec((1, c_out), lambda i, k: (0, 0)),       # fc bias
            ],
            out_specs=pl.BlockSpec((tm, c_out), lambda i, k: (i, 0)),
            scratch_shapes=[pltpu.VMEM((tm, c_out), jnp.float32)],
        ),
        compiler_params=pltpu.CompilerParams(
            dimension_semantics=("parallel", "arbitrary")),
    )(feat.astype(jnp.float32), w_t, b2)

    return out[:n]


def _reference_forward(feat_nchw, fc_w, fc_b):
    """Pure-JAX reference matching the PyTorch head semantics."""
    pooled = jnp.mean(feat_nchw, axis=(2, 3))                         # (N, C_in)
    y = jnp.dot(pooled, fc_w.T,
                precision=jax.lax.Precision.HIGHEST) + fc_b           # (N, C_out)
    norm = jnp.sqrt(jnp.sum(y * y, axis=1, keepdims=True))
    return y / norm


if __name__ == "__main__":
    key = jax.random.PRNGKey(0)
    k1, k2, k3 = jax.random.split(key, 3)

    # Small shapes consistent with the module: the fc is Linear(2048, 1024),
    # so the post-layer4 feature map is (N, 2048, h, w); use N=2, 4x4 spatial.
    N, C_IN, H, W_SP, C_OUT = 2, 2048, 4, 4, 1024
    feat = jax.random.normal(k1, (N, C_IN, H, W_SP), dtype=jnp.float32)
    fc_w = jax.random.normal(k2, (C_OUT, C_IN), dtype=jnp.float32) * 0.02
    fc_b = jax.random.normal(k3, (C_OUT,), dtype=jnp.float32) * 0.02

    out = se_resnext50_head(feat, fc_w, fc_b)
    out = jax.block_until_ready(out)

    ref = _reference_forward(feat, fc_w, fc_b)
    assert out.shape == (N, C_OUT), out.shape
    max_err = float(jnp.max(jnp.abs(out - ref)))
    assert jnp.allclose(out, ref, rtol=1e-2, atol=1e-3), max_err

    print("KERNEL_OK")
</pallas_src>

<mosaic_0001>
module attributes {stable_mosaic.version = 11 : i64} {
  func.func @_head_kernel(%arg0: i32, %arg1: i32, %arg2: memref<8x16x512xf32, #tpu.memory_space<vmem>>, %arg3: memref<512x1024xf32, #tpu.memory_space<vmem>>, %arg4: memref<1x1024xf32, #tpu.memory_space<vmem>>, %arg5: memref<8x1024xf32, #tpu.memory_space<vmem>>, %arg6: memref<8x1024xf32, #tpu.memory_space<vmem>>) attributes {dimension_semantics = [#tpu.dimension_semantics<parallel>, #tpu.dimension_semantics<arbitrary>], iteration_bounds = array<i64: 1, 4>, scalar_prefetch = 0 : i64, scratch_operands = 1 : i64, tpu.core_type = #tpu.core_type<tc>, window_params = [{transform_indices = @transform_0, window_bounds = array<i64: 8, 16, 512>}, {transform_indices = @transform_1, window_bounds = array<i64: 512, 1024>}, {pipeline_mode = #tpu.pipeline_mode<synchronous>, transform_indices = @transform_2, window_bounds = array<i64: 1, 1024>}, {transform_indices = @transform_3, window_bounds = array<i64: 8, 1024>}]} {
    %c0_i32 = arith.constant 0 : i32
    %0 = arith.cmpi eq, %arg1, %c0_i32 : i32
    %1 = arith.extui %0 : i1 to i32
    %c0_i32_0 = arith.constant 0 : i32
    %2 = arith.cmpi ne, %1, %c0_i32_0 : i32
    scf.if %2 {
      %cst_12 = arith.constant 0.000000e+00 : f32
      %15 = vector.broadcast %cst_12 : f32 to vector<8x1024xf32>
      %c0_13 = arith.constant 0 : index
      %c0_14 = arith.constant 0 : index
      %16 = vector.load %arg6[%c0_13, %c0_14] : memref<8x1024xf32, #tpu.memory_space<vmem>>, vector<8x1024xf32>
      tpu.vector_store %arg6[%c0_13, %c0_14], %15 {strides = array<i32>} : memref<8x1024xf32, #tpu.memory_space<vmem>>, vector<8x1024xf32>,
    } else {
    }
    %c0 = arith.constant 0 : index
    %c0_1 = arith.constant 0 : index
    %c0_2 = arith.constant 0 : index
    %3 = vector.load %arg2[%c0, %c0_1, %c0_2] : memref<8x16x512xf32, #tpu.memory_space<vmem>>, vector<8x16x512xf32>
    %cst = arith.constant dense<0.000000e+00> : vector<8x512xf32>
    %4 = vector.multi_reduction <add>, %3, %cst [1] : vector<8x16x512xf32> to vector<8x512xf32>
    %cst_3 = arith.constant 6.250000e-02 : f32
    %5 = vector.broadcast %cst_3 : f32 to vector<8x512xf32>
    %6 = arith.mulf %4, %5 : vector<8x512xf32>
    %c0_4 = arith.constant 0 : index
    %c0_5 = arith.constant 0 : index
    %7 = vector.load %arg6[%c0_4, %c0_5] : memref<8x1024xf32, #tpu.memory_space<vmem>>, vector<8x1024xf32>
    %c0_6 = arith.constant 0 : index
    %c0_7 = arith.constant 0 : index
    %8 = vector.load %arg3[%c0_6, %c0_7] : memref<512x1024xf32, #tpu.memory_space<vmem>>, vector<512x1024xf32>
    %cst_8 = arith.constant dense<0.000000e+00> : vector<8x1024xf32>
    %9 = tpu.matmul %6, %8, %cst_8 {dimension_numbers = #tpu.dot_dimension_numbers<[1], [0], [0], [1], [0, 0, 1, 1], [], []>} : vector<8x512xf32>, vector<512x1024xf32>, vector<8x1024xf32> -> vector<8x1024xf32>
    %10 = arith.addf %7, %9 : vector<8x1024xf32>
    %c0_9 = arith.constant 0 : index
    %c0_10 = arith.constant 0 : index
    %11 = vector.load %arg6[%c0_9, %c0_10] : memref<8x1024xf32, #tpu.memory_space<vmem>>, vector<8x1024xf32>
    tpu.vector_store %arg6[%c0_9, %c0_10], %10 {strides = array<i32>} : memref<8x1024xf32, #tpu.memory_space<vmem>>, vector<8x1024xf32>,
    %c3_i32 = arith.constant 3 : i32
    %12 = arith.cmpi eq, %arg1, %c3_i32 : i32
    %13 = arith.extui %12 : i1 to i32
    %c0_i32_11 = arith.constant 0 : i32
    %14 = arith.cmpi ne, %13, %c0_i32_11 : i32
    scf.if %14 {
      %c0_12 = arith.constant 0 : index
      %c0_13 = arith.constant 0 : index
      %15 = vector.load %arg6[%c0_12, %c0_13] : memref<8x1024xf32, #tpu.memory_space<vmem>>, vector<8x1024xf32>
      %c0_14 = arith.constant 0 : index
      %c0_15 = arith.constant 0 : index
      %16 = vector.load %arg4[%c0_14, %c0_15] : memref<1x1024xf32, #tpu.memory_space<vmem>>, vector<1x1024xf32>
      %17 = vector.broadcast %16 : vector<1x1024xf32> to vector<8x1024xf32>
      %18 = arith.addf %15, %17 : vector<8x1024xf32>
      %19 = arith.mulf %18, %18 : vector<8x1024xf32>
      %cst_16 = arith.constant dense<0.000000e+00> : vector<8xf32>
      %20 = vector.multi_reduction <add>, %19, %cst_16 [1] : vector<8x1024xf32> to vector<8xf32>
      %21 = vector.shape_cast %20 : vector<8xf32> to vector<8x1xf32>
      %22 = math.rsqrt %21 : vector<8x1xf32>
      %23 = vector.broadcast %22 : vector<8x1xf32> to vector<8x1024xf32>
      %24 = arith.mulf %18, %23 : vector<8x1024xf32>
      %c0_17 = arith.constant 0 : index
      %c0_18 = arith.constant 0 : index
      %25 = vector.load %arg5[%c0_17, %c0_18] : memref<8x1024xf32, #tpu.memory_space<vmem>>, vector<8x1024xf32>
      tpu.vector_store %arg5[%c0_17, %c0_18], %24 {strides = array<i32>} : memref<8x1024xf32, #tpu.memory_space<vmem>>, vector<8x1024xf32>,
    } else {
    }
    return
  }
  func.func @transform_0(%arg0: i32, %arg1: i32) -> (i32, i32, i32) {
    %c0_i32 = arith.constant 0 : i32
    %c0_i32_0 = arith.constant 0 : i32
    return %arg0, %c0_i32, %arg1 : i32, i32, i32
  }
  func.func @transform_1(%arg0: i32, %arg1: i32) -> (i32, i32) {
    %c0_i32 = arith.constant 0 : i32
    %c0_i32_0 = arith.constant 0 : i32
    return %arg1, %c0_i32 : i32, i32
  }
  func.func @transform_2(%arg0: i32, %arg1: i32) -> (i32, i32) {
    %c0_i32 = arith.constant 0 : i32
    %c0_i32_0 = arith.constant 0 : i32
    %c0_i32_1 = arith.constant 0 : i32
    return %c0_i32, %c0_i32_0 : i32, i32
  }
  func.func @transform_3(%arg0: i32, %arg1: i32) -> (i32, i32) {
    %c0_i32 = arith.constant 0 : i32
    %c0_i32_0 = arith.constant 0 : i32
    return %arg0, %c0_i32 : i32, i32
  }
}

</mosaic_0001>

<bundles_post_ra>
// kernel: tpu_custom_call.1
= control target key start
LH: loop header
LB: loop body
LE: loop exit
PB: predicated region body
PF: predicated region fallthrough
CT: control target
= control target key end

     0   :  { %s3128_s0 = inlined_call_operand.hbm [shape: f32[8,16,2048], index: 0, kind: input, shape index: {}]   ;;  %s3129_s1 = inlined_call_operand.hbm [shape: f32[2048,1024], index: 1, kind: input, shape index: {}]   ;;  %s3130_s2 = inlined_call_operand.hbm [shape: f32[1,1024], index: 2, kind: input, shape index: {}]   ;;  %s3131_s3 = inlined_call_operand.hbm [shape: f32[8,1024], index: 3, kind: output, shape index: {}]  }
   0x1   :  { %3133 = sst [smem:[#allocation15_spill]] %s3128_s0 }
   0x2   :  { %3134 = sst [smem:[#allocation16_spill]] %s3130_s2 }
   0x3   :  { %8 = vsyncpa [#allocation4], 0 }
   0x4   :  { %10 = vsyncpa [#allocation4 + $0x1], 0 }
   0x5   :  { %11 = vsyncpa [#allocation7], 0 }
   0x6   :  { %13 = vsyncpa [#allocation7 + $0x1], 0 }
   0x7   :  { %14 = vsyncpa [#allocation5], 0  ;;  %s2349_s12 = smov 0   ;;  %s2351_s13 = smov 0  }
   0x8   :  { %s2353_s14 = smov 0   ;;  %s2355_s15 = smov 0  }
   0x9   :  { %s2357_s16 = smov 0   ;;  %s2359_s17 = smov 0  }
   0xa LB: > { %s2378_s18 = sadd.s32 4294967295, %s2319_s17   ;;  %s41_s19 = sadd.s32 1, %s2307_s14  ;;  %s2319_s17 = sphi %s2359_s17, %s20_s17   ;;  %s2315_s16 = sphi %s2357_s16, %s3147_s16   ;;  %s2311_s15 = sphi %s2355_s15, %s3146_s15   ;;  %s2307_s14 = sphi %s2353_s14, %s3145_s14   ;;  %s2303_s13 = sphi %s2351_s13, %s3144_s13   ;;  %s2299_s12 = sphi %s2349_s12, %s3143_s12  }
   0xb   : > { %p48_p0 = scmp.ne.s32.totalorder %s2307_s14, %s2303_s13  ;;  %p49_p1 = scmp.eq.s32.totalorder %s2319_s17, 0 }
   0xc   : > { %p54_p2 = scmp.ne.s32.totalorder %s2303_s13, %s2299_s12  ;;  %p55_p3 = scmp.eq.s32.totalorder %s2378_s18, 0 }
   0xd   : > { %p2386_p4 = por %p49_p1, %p48_p0  ;;  %p2030_p5 = scmp.ge.s32.totalorder %s2319_s17, 1 }
   0xe   : > { %p2393_p6 = por %p55_p3, %p54_p2  ;;  %p138_p7 = scmp.lt.s32.totalorder %s2319_s17, 5 }
   0xf   : > { %s3137_s2 = sld [smem:[#allocation16_spill]]  ;;  %s2321_s26 = smov [#allocation8]  }
  0x10   : > { %p2401_p8 = pnand %p2030_p5, %p138_p7  ;;  %s152_s27 = sshll.u32 %s2321_s26, 4  ;;  %s153_s27 = int_to_ptr.vmem [resolvable:$true] %s152_s27 }
  0x11   : > { %p2077_p10 = scmp.lt.s32.totalorder %s2319_s17, 4  ;;  %s29_s29 = sadd.s32 1, %s2315_s16 }
  0x12   : > { %p2065_p9 = pneg %p2401_p8  ;;  %p30_p13 = scmp.ge.s32.totalorder %s29_s29, 4 }
  0x13   : > { %p2412_p12 = pnand %p2077_p10, %p2386_p4  ;;  %s163_s30 = sand.u32 1, %s2307_s14  }
  0x14   : > { %p2066_p11 = pnand %p2065_p9, %p55_p3  ;;  %s2050_s4 = sshll.u32 %s2315_s16, 5 }
  0x15   : > { %s150_s24 = sshll.u32 %s3137_s2, 4  ;;  %s3149_s29 = smov (%p30_p13, %s29_s29), 0  ;;  %s151_s24 = int_to_ptr.hbm [resolvable:$true] %s150_s24 }
  0x16   : > { %2068 = dma.hbm_to_vmem [thread:$0]  (!%p2066_p11), %s151_s24, 128, %s153_s27, [#allocation7]  }
  0x17   : > { %3140 = sst [smem:[#allocation14_spill]] %s3149_s29  ;;  %s2033_s5 = sshll.u32 %s163_s30, 9 }
  0x18   : > { %s37_s6 = ssub.s32 %s2315_s16, %s3149_s29  ;;  %s3141_s0 = sld [smem:[#allocation15_spill]] }
  0x19   : > { %p39_p0 = scmp.eq.s32.totalorder %s37_s6, 0  ;;  %s167_s11 = scalar_lea.vmem [#allocation3], %s2033_s5 }
  0x1a   : > { %s178_s12 = sshll.u32 %s167_s11, 4  ;;  %s188_s22 = sand.u32 1, %s2319_s17   ;;  %s179_s12 = int_to_ptr.vmem [resolvable:$true] %s178_s12 }
  0x1b   : > { %s2429_s20 = scalar_select %p39_p0, %s2307_s14, %s41_s19  }
  0x1c   : > { %s164_s23 = scalar_lea.sflag [#allocation4], %s163_s30  ;;  %s2322_s24 = smov 2048  }
  0x1d   : > { %s2323_s26 = smov 512   ;;  %s2324_s27 = smov 32  }
  0x1e   : > { %s175_s9 = scalar_lea.hbm %s3141_s0, %s2050_s4  ;;  %s2036_s6 = sshll.u32 %s163_s30, 12 }
  0x1f   : > { %s176_s10 = sshll.u32 %s175_s9, 4  ;;  %s2052_s2 = sshll.u32 %s2315_s16, 12  ;;  %s177_s10 = int_to_ptr.hbm [resolvable:$true] %s176_s10 }
  0x20   : > { %2072 = dma.hbm_to_vmem [thread:$0]  (!%p2412_p12), %s177_s10, 8192, %s179_s12, %s164_s23, %s2322_s24, %s2323_s26, %s2324_s27  }
  0x21   : > { %s198_s5 = scalar_lea.hbm %s3129_s1, %s2052_s2  ;;  %s192_s8 = scalar_lea.vmem [#allocation6], %s2036_s6 }
  0x22   : > { %s201_s9 = sshll.u32 %s192_s8, 4  ;;  %s199_s19 = sshll.u32 %s198_s5, 4  ;;  %s202_s9 = int_to_ptr.vmem [resolvable:$true] %s201_s9  ;;  %s200_s19 = int_to_ptr.hbm [resolvable:$true] %s199_s19 }
  0x23   : > { %s189_s11 = scalar_lea.sflag [#allocation7], %s188_s22  ;;  %s2325_s0 = smov 1024  }
  0x24   : > { %s2326_s29 = smov 64   ;;  %213 = sbr.rel (%p2401_p8) target bundleno = 709 (0x2c5), region = 32 }
  0x25   : > { %2075 = dma.hbm_to_vmem [thread:$0]  (!%p2412_p12), %s200_s19, 65536, %s202_s9, %s189_s11, %s2325_s0, %s2325_s0, %s2326_s29  }
  0x26   : > { %s215_s30 = sand.u32 (!%p2401_p8), 1, %s2303_s13  }
  0x27   : > { %s2041_s10 = sshll.u32 (!%p2401_p8), %s215_s30, 9  ;;  %s216_s12 = scalar_lea.sflag (!%p2401_p8), [#allocation4], %s215_s30 }
  0x28   : > { %s2443_s23 = scalar_lea.vmem (!%p2401_p8), [#allocation3], %s2041_s10 }
  0x29   : > { %2282 = dma.done.wait (%p2393_p6), %s216_s12, 8192  }
  0x2a   : > { %2284 = vsyncadd (%p2393_p6), %s216_s12, 4294959104  ;;  %s225_s2 = sand.u32 1, %s2378_s18   ;;  %s2042_s28 = sshll.u32 %s215_s30, 12 }
  0x2b   : > { %s226_s0 = scalar_lea.sflag [#allocation7], %s225_s2  ;;  %s2450_s29 = scalar_lea.vmem [#allocation6], %s2042_s28 }
  0x2c   : > { %2286 = dma.done.wait (%p2393_p6), %s226_s0, 65536  }
  0x2d   : > { %2288 = vsyncadd (%p2393_p6), %s226_s0, 4294901760 }
  0x2e   : > { %2290 = dma.done.wait (%p55_p3), [#allocation7], 128  }
  0x2f   : > { %2292 = vsyncadd (%p55_p3), [#allocation7], 4294967168  ;;  %p2044_p1 = scmp.ne.s32.totalorder %s2311_s15, 0 }
  0x31   : > { %264 = sbr.rel (%p2044_p1) target bundleno = 63 (0x3f), region = 48 }
  0x36   : > { %v2327_v0 = vmov 0.0  }
  0x37   : > { %265 = vst [vmem:[#allocation2 + $0x30] sm:$0xff] %v2327_v0 }
  0x38   : > { %266 = vst [vmem:[#allocation2] sm:$0xff] %v2327_v0 }
  0x39   : > { %267 = vst [vmem:[#allocation2 + $0x18] sm:$0xff] %v2327_v0 }
  0x3a   : > { %268 = vst [vmem:[#allocation2 + $0x10] sm:$0xff] %v2327_v0 }
  0x3b   : > { %269 = vst [vmem:[#allocation2 + $0x8] sm:$0xff] %v2327_v0 }
  0x3c   : > { %270 = vst [vmem:[#allocation2 + $0x20] sm:$0xff] %v2327_v0 }
  0x3d   : > { %271 = vst [vmem:[#allocation2 + $0x28] sm:$0xff] %v2327_v0 }
  0x3e   : > { %272 = vst [vmem:[#allocation2 + $0x38] sm:$0xff] %v2327_v0 }
  0x3f PF: > { %v977_v1 = vld [vmem:[%s2450_s29 + $0xbc0] sm:$0xff]  ;;  %v978_v63 = vld [vmem:[%s2450_s29 + $0xbc8] sm:$0xff]  ;;  %vm1145_vm0 = vcmask 1041409   ;;  %vm1147_vm1 = vcmask 1042434   ;;  %vm1149_vm2 = vcmask 1043459   ;;  %vm1151_vm3 = vcmask 1044484  }
  0x40   : > { %v969_v2 = vld [vmem:[%s2450_s29 + $0xb80] sm:$0xff]  ;;  %1224 = vmatpush.msra.mxu2 %v977_v1  ;;  %v1106_v0 = vld [vmem:[%s2450_s29 + $0xfc8] sm:$0xff]  ;;  %vm1153_vm4 = vcmask 1045509   ;;  %vm1155_vm5 = vcmask 1046534   ;;  %vm1157_vm6 = vcmask 1047559   ;;  %p2045_p2 = scmp.ne.s32.totalorder %s2311_s15, 3 }
  0x41   : > { %v1105_v3 = vld [vmem:[%s2450_s29 + $0xfc0] sm:$0xff] }
  0x42   : > { %1244 = vmatpush.msra.mxu3 %v1105_v3  ;;  %v721_v4 = vld [vmem:[%s2450_s29 + $0x3c0] sm:$0xff]  ;;  %1225 = vmatpush.msra.mxu2 %v969_v2  ;;  %v970_v3 = vld [vmem:[%s2450_s29 + $0xb88] sm:$0xff] }
  0x43   : > { %v849_v5 = vld [vmem:[%s2450_s29 + $0x7c0] sm:$0xff]  ;;  %1184 = vmatpush.msra.mxu0 %v721_v4  ;;  %v722_v4 = vld [vmem:[%s2450_s29 + $0x3c8] sm:$0xff] }
  0x44   : > { %v961_v6 = vld [vmem:[%s2450_s29 + $0xb40] sm:$0xff]  ;;  %1204 = vmatpush.msra.mxu1 %v849_v5  ;;  %v850_v5 = vld [vmem:[%s2450_s29 + $0x7c8] sm:$0xff] }
  0x45   : > { %v1097_v7 = vld [vmem:[%s2450_s29 + $0xf80] sm:$0xff]  ;;  %1226 = vmatpush.msra.mxu2 %v961_v6  ;;  %v1098_v6 = vld [vmem:[%s2450_s29 + $0xf88] sm:$0xff] }
  0x46   : > { %v713_v8 = vld [vmem:[%s2450_s29 + $0x380] sm:$0xff]  ;;  %1245 = vmatpush.msra.mxu3 %v1097_v7  ;;  %v962_v7 = vld [vmem:[%s2450_s29 + $0xb48] sm:$0xff] }
  0x47   : > { %v841_v9 = vld [vmem:[%s2450_s29 + $0x780] sm:$0xff]  ;;  %1185 = vmatpush.msra.mxu0 %v713_v8  ;;  %v714_v8 = vld [vmem:[%s2450_s29 + $0x388] sm:$0xff] }
  0x48   : > { %v1089_v10 = vld [vmem:[%s2450_s29 + $0xf40] sm:$0xff]  ;;  %1205 = vmatpush.msra.mxu1 %v841_v9  ;;  %v842_v9 = vld [vmem:[%s2450_s29 + $0x788] sm:$0xff] }
  0x49   : > { %v705_v11 = vld [vmem:[%s2450_s29 + $0x340] sm:$0xff]  ;;  %1246 = vmatpush.msra.mxu3 %v1089_v10  ;;  %v1090_v10 = vld [vmem:[%s2450_s29 + $0xf48] sm:$0xff] }
  0x4a   : > { %v953_v12 = vld [vmem:[%s2450_s29 + $0xb00] sm:$0xff]  ;;  %1186 = vmatpush.msra.mxu0 %v705_v11  ;;  %v954_v11 = vld [vmem:[%s2450_s29 + $0xb08] sm:$0xff] }
  0x4b   : > { %v833_v13 = vld [vmem:[%s2450_s29 + $0x740] sm:$0xff]  ;;  %1227 = vmatpush.msra.mxu2 %v953_v12  ;;  %v706_v12 = vld [vmem:[%s2450_s29 + $0x348] sm:$0xff] }
  0x4c   : > { %v1081_v14 = vld [vmem:[%s2450_s29 + $0xf00] sm:$0xff]  ;;  %1206 = vmatpush.msra.mxu1 %v833_v13  ;;  %v834_v13 = vld [vmem:[%s2450_s29 + $0x748] sm:$0xff] }
  0x4d   : > { %v697_v15 = vld [vmem:[%s2450_s29 + $0x300] sm:$0xff]  ;;  %1247 = vmatpush.msra.mxu3 %v1081_v14  ;;  %v1082_v14 = vld [vmem:[%s2450_s29 + $0xf08] sm:$0xff] }
  0x4e   : > { %v825_v16 = vld [vmem:[%s2450_s29 + $0x700] sm:$0xff]  ;;  %1187 = vmatpush.msra.mxu0 %v697_v15  ;;  %v946_v15 = vld [vmem:[%s2450_s29 + $0xac8] sm:$0xff] }
  0x4f   : > { %v945_v17 = vld [vmem:[%s2450_s29 + $0xac0] sm:$0xff]  ;;  %1207 = vmatpush.msra.mxu1 %v825_v16  ;;  %v698_v16 = vld [vmem:[%s2450_s29 + $0x308] sm:$0xff] }
  0x50   : > { %v1073_v18 = vld [vmem:[%s2450_s29 + $0xec0] sm:$0xff]  ;;  %1228 = vmatpush.msra.mxu2 %v945_v17  ;;  %v826_v17 = vld [vmem:[%s2450_s29 + $0x708] sm:$0xff] }
  0x51   : > { %v689_v19 = vld [vmem:[%s2450_s29 + $0x2c0] sm:$0xff]  ;;  %1248 = vmatpush.msra.mxu3 %v1073_v18  ;;  %v938_v18 = vld [vmem:[%s2450_s29 + $0xa88] sm:$0xff] }
  0x52   : > { %v817_v20 = vld [vmem:[%s2450_s29 + $0x6c0] sm:$0xff]  ;;  %1188 = vmatpush.msra.mxu0 %v689_v19  ;;  %v1074_v19 = vld [vmem:[%s2450_s29 + $0xec8] sm:$0xff] }
  0x53   : > { %v937_v21 = vld [vmem:[%s2450_s29 + $0xa80] sm:$0xff]  ;;  %1208 = vmatpush.msra.mxu1 %v817_v20  ;;  %v690_v20 = vld [vmem:[%s2450_s29 + $0x2c8] sm:$0xff] }
  0x54   : > { %v1065_v22 = vld [vmem:[%s2450_s29 + $0xe80] sm:$0xff]  ;;  %1229 = vmatpush.msra.mxu2 %v937_v21  ;;  %v818_v21 = vld [vmem:[%s2450_s29 + $0x6c8] sm:$0xff] }
  0x55   : > { %v681_v23 = vld [vmem:[%s2450_s29 + $0x280] sm:$0xff]  ;;  %1249 = vmatpush.msra.mxu3 %v1065_v22  ;;  %v930_v22 = vld [vmem:[%s2450_s29 + $0xa48] sm:$0xff] }
  0x56   : > { %v809_v24 = vld [vmem:[%s2450_s29 + $0x680] sm:$0xff]  ;;  %1189 = vmatpush.msra.mxu0 %v681_v23  ;;  %v1066_v23 = vld [vmem:[%s2450_s29 + $0xe88] sm:$0xff] }
  0x57   : > { %v929_v25 = vld [vmem:[%s2450_s29 + $0xa40] sm:$0xff]  ;;  %1209 = vmatpush.msra.mxu1 %v809_v24  ;;  %v682_v24 = vld [vmem:[%s2450_s29 + $0x288] sm:$0xff] }
  0x58   : > { %v1057_v26 = vld [vmem:[%s2450_s29 + $0xe40] sm:$0xff]  ;;  %1230 = vmatpush.msra.mxu2 %v929_v25  ;;  %v810_v25 = vld [vmem:[%s2450_s29 + $0x688] sm:$0xff] }
  0x59   : > { %v673_v27 = vld [vmem:[%s2450_s29 + $0x240] sm:$0xff]  ;;  %1250 = vmatpush.msra.mxu3 %v1057_v26  ;;  %v1058_v26 = vld [vmem:[%s2450_s29 + $0xe48] sm:$0xff] }
  0x5a   : > { %v801_v28 = vld [vmem:[%s2450_s29 + $0x640] sm:$0xff]  ;;  %1190 = vmatpush.msra.mxu0 %v673_v27  ;;  %v922_v27 = vld [vmem:[%s2450_s29 + $0xa08] sm:$0xff] }
  0x5b   : > { %v921_v29 = vld [vmem:[%s2450_s29 + $0xa00] sm:$0xff]  ;;  %1210 = vmatpush.msra.mxu1 %v801_v28  ;;  %v674_v28 = vld [vmem:[%s2450_s29 + $0x248] sm:$0xff] }
  0x5c   : > { %v1049_v30 = vld [vmem:[%s2450_s29 + $0xe00] sm:$0xff]  ;;  %1231 = vmatpush.msra.mxu2 %v921_v29  ;;  %v275_v29 = vld [vmem:[%s2443_s23 + $0x10] sm:$0xff] }
  0x5d   : > { %v665_v31 = vld [vmem:[%s2450_s29 + $0x200] sm:$0xff]  ;;  %1251 = vmatpush.msra.mxu3 %v1049_v30  ;;  %v279_v30 = vld [vmem:[%s2443_s23 + $0x30] sm:$0xff] }
  0x5e   : > { %v793_v32 = vld [vmem:[%s2450_s29 + $0x600] sm:$0xff]  ;;  %1191 = vmatpush.msra.mxu0 %v665_v31  ;;  %v283_v31 = vld [vmem:[%s2443_s23 + $0x50] sm:$0xff] }
  0x5f   : > { %v913_v33 = vld [vmem:[%s2450_s29 + $0x9c0] sm:$0xff]  ;;  %1211 = vmatpush.msra.mxu1 %v793_v32  ;;  %v802_v32 = vld [vmem:[%s2450_s29 + $0x648] sm:$0xff] }
  0x60   : > { %v1041_v34 = vld [vmem:[%s2450_s29 + $0xdc0] sm:$0xff]  ;;  %1232 = vmatpush.msra.mxu2 %v913_v33  ;;  %v1050_v33 = vld [vmem:[%s2450_s29 + $0xe08] sm:$0xff] }
  0x61   : > { %v657_v35 = vld [vmem:[%s2450_s29 + $0x1c0] sm:$0xff]  ;;  %1252 = vmatpush.msra.mxu3 %v1041_v34  ;;  %v287_v34 = vld [vmem:[%s2443_s23 + $0x70] sm:$0xff] }
  0x62   : > { %v785_v36 = vld [vmem:[%s2450_s29 + $0x5c0] sm:$0xff]  ;;  %1192 = vmatpush.msra.mxu0 %v657_v35  ;;  %v291_v35 = vld [vmem:[%s2443_s23 + $0x90] sm:$0xff] }
  0x63   : > { %v905_v37 = vld [vmem:[%s2450_s29 + $0x980] sm:$0xff]  ;;  %1212 = vmatpush.msra.mxu1 %v785_v36  ;;  %v295_v36 = vld [vmem:[%s2443_s23 + $0xb0] sm:$0xff] }
  0x64   : > { %v1033_v38 = vld [vmem:[%s2450_s29 + $0xd80] sm:$0xff]  ;;  %1233 = vmatpush.msra.mxu2 %v905_v37  ;;  %v351_v37 = vadd.f32 %v279_v30, %v275_v29  ;;  %v882_v30 = vld [vmem:[%s2450_s29 + $0x8c8] sm:$0xff] }
  0x65   : > { %v649_v39 = vld [vmem:[%s2450_s29 + $0x180] sm:$0xff]  ;;  %1253 = vmatpush.msra.mxu3 %v1033_v38  ;;  %v914_v38 = vld [vmem:[%s2450_s29 + $0x9c8] sm:$0xff] }
  0x66   : > { %v777_v40 = vld [vmem:[%s2450_s29 + $0x580] sm:$0xff]  ;;  %1193 = vmatpush.msra.mxu0 %v649_v39  ;;  %v666_v39 = vld [vmem:[%s2450_s29 + $0x208] sm:$0xff] }
  0x67   : > { %v897_v41 = vld [vmem:[%s2450_s29 + $0x940] sm:$0xff]  ;;  %1213 = vmatpush.msra.mxu1 %v777_v40  ;;  %v299_v40 = vld [vmem:[%s2443_s23 + $0xd0] sm:$0xff] }
  0x68   : > { %v1025_v42 = vld [vmem:[%s2450_s29 + $0xd40] sm:$0xff]  ;;  %1234 = vmatpush.msra.mxu2 %v897_v41  ;;  %v303_v41 = vld [vmem:[%s2443_s23 + $0xf0] sm:$0xff] }
  0x69   : > { %v641_v43 = vld [vmem:[%s2450_s29 + $0x140] sm:$0xff]  ;;  %1254 = vmatpush.msra.mxu3 %v1025_v42  ;;  %v307_v42 = vld [vmem:[%s2443_s23 + $0x110] sm:$0xff] }
  0x6a   : > { %v769_v44 = vld [vmem:[%s2450_s29 + $0x540] sm:$0xff]  ;;  %1194 = vmatpush.msra.mxu0 %v641_v43  ;;  %v379_v43 = vadd.f32 %v287_v34, %v283_v31  ;;  %v1018_v31 = vld [vmem:[%s2450_s29 + $0xd08] sm:$0xff] }
  0x6b   : > { %v889_v45 = vld [vmem:[%s2450_s29 + $0x900] sm:$0xff]  ;;  %1214 = vmatpush.msra.mxu1 %v769_v44  ;;  %v407_v44 = vadd.f32 %v295_v36, %v291_v35 }
  0x6c   : > { %v1017_v46 = vld [vmem:[%s2450_s29 + $0xd00] sm:$0xff]  ;;  %1235 = vmatpush.msra.mxu2 %v889_v45  ;;  %v311_v45 = vld [vmem:[%s2443_s23 + $0x130] sm:$0xff] }
  0x6d   : > { %v633_v47 = vld [vmem:[%s2450_s29 + $0x100] sm:$0xff]  ;;  %1255 = vmatpush.msra.mxu3 %v1017_v46  ;;  %v315_v46 = vld [vmem:[%s2443_s23 + $0x150] sm:$0xff] }
  0x6e   : > { %v761_v48 = vld [vmem:[%s2450_s29 + $0x500] sm:$0xff]  ;;  %1195 = vmatpush.msra.mxu0 %v633_v47  ;;  %v319_v47 = vld [vmem:[%s2443_s23 + $0x170] sm:$0xff] }
  0x6f   : > { %v881_v49 = vld [vmem:[%s2450_s29 + $0x8c0] sm:$0xff]  ;;  %1215 = vmatpush.msra.mxu1 %v761_v48  ;;  %v352_v48 = vrot.slane %v351_v37, 4 }
  0x70   : > { %v1009_v50 = vld [vmem:[%s2450_s29 + $0xcc0] sm:$0xff]  ;;  %1236 = vmatpush.msra.mxu2 %v881_v49  ;;  %v435_v49 = vadd.f32 %v303_v41, %v299_v40 }
  0x71   : > { %v625_v51 = vld [vmem:[%s2450_s29 + $0xc0] sm:$0xff]  ;;  %1256 = vmatpush.msra.mxu3 %v1009_v50  ;;  %v323_v50 = vld [vmem:[%s2443_s23 + $0x190] sm:$0xff] }
  0x72   : > { %v753_v52 = vld [vmem:[%s2450_s29 + $0x4c0] sm:$0xff]  ;;  %1196 = vmatpush.msra.mxu0 %v625_v51  ;;  %v327_v51 = vld [vmem:[%s2443_s23 + $0x1b0] sm:$0xff] }
  0x73   : > { %v873_v53 = vld [vmem:[%s2450_s29 + $0x880] sm:$0xff]  ;;  %1216 = vmatpush.msra.mxu1 %v753_v52  ;;  %v331_v52 = vld [vmem:[%s2443_s23 + $0x1d0] sm:$0xff] }
  0x74   : > { %v1001_v54 = vld [vmem:[%s2450_s29 + $0xc80] sm:$0xff]  ;;  %1237 = vmatpush.msra.mxu2 %v873_v53  ;;  %v380_v53 = vrot.slane %v379_v43, 4 }
  0x75   : > { %v617_v55 = vld [vmem:[%s2450_s29 + $0x80] sm:$0xff]  ;;  %1257 = vmatpush.msra.mxu3 %v1001_v54  ;;  %v408_v54 = vrot.slane %v407_v44, 4 }
  0x76   : > { %v745_v56 = vld [vmem:[%s2450_s29 + $0x480] sm:$0xff]  ;;  %1197 = vmatpush.msra.mxu0 %v617_v55  ;;  %v463_v55 = vadd.f32 %v311_v45, %v307_v42  ;;  %v754_v45 = vld [vmem:[%s2450_s29 + $0x4c8] sm:$0xff] }
  0x77   : > { %v865_v57 = vld [vmem:[%s2450_s29 + $0x840] sm:$0xff]  ;;  %1217 = vmatpush.msra.mxu1 %v745_v56  ;;  %v491_v56 = vadd.f32 %v319_v47, %v315_v46  ;;  %v1002_v46 = vld [vmem:[%s2450_s29 + $0xc88] sm:$0xff] }
  0x78   : > { %v993_v58 = vld [vmem:[%s2450_s29 + $0xc40] sm:$0xff]  ;;  %1238 = vmatpush.msra.mxu2 %v865_v57  ;;  %v794_v57 = vld [vmem:[%s2450_s29 + $0x608] sm:$0xff] }
  0x79   : > { %v609_v59 = vld [vmem:[%s2450_s29 + $0x40] sm:$0xff]  ;;  %1258 = vmatpush.msra.mxu3 %v993_v58  ;;  %v1042_v58 = vld [vmem:[%s2450_s29 + $0xdc8] sm:$0xff] }
  0x7a   : > { %v737_v60 = vld [vmem:[%s2450_s29 + $0x440] sm:$0xff]  ;;  %1198 = vmatpush.msra.mxu0 %v609_v59  ;;  %v335_v59 = vld [vmem:[%s2443_s23 + $0x1f0] sm:$0xff] }
  0x7b   : > { %v857_v61 = vld [vmem:[%s2450_s29 + $0x800] sm:$0xff]  ;;  %1218 = vmatpush.msra.mxu1 %v737_v60  ;;  %v353_v60 = vadd.f32 %v352_v48, %v351_v37  ;;  %v762_v37 = vld [vmem:[%s2450_s29 + $0x508] sm:$0xff] }
  0x7c   : > { %v985_v62 = vld [vmem:[%s2450_s29 + $0xc00] sm:$0xff]  ;;  %1239 = vmatpush.msra.mxu2 %v857_v61  ;;  %v436_v61 = vrot.slane %v435_v49, 4 }
  0x7d   : > { %v601_v1 = vld [vmem:[%s2450_s29] sm:$0xff]  ;;  %1259 = vmatpush.msra.mxu3 %v985_v62  ;;  %v519_v62 = vadd.f32 %v327_v51, %v323_v50  ;;  %v866_v51 = vld [vmem:[%s2450_s29 + $0x848] sm:$0xff] }
  0x7e   : > { %v729_v2 = vld [vmem:[%s2450_s29 + $0x400] sm:$0xff]  ;;  %1304 = vmatpush.msrb.mxu2 %v978_v63  ;;  %1199 = vmatpush.msra.mxu0 %v601_v1  ;;  %v906_v63 = vld [vmem:[%s2450_s29 + $0x988] sm:$0xff]  ;;  %v381_v1 = vadd.f32 %v380_v53, %v379_v43 }
  0x7f   : > { %1324 = vmatpush.msrb.mxu3 %v1106_v0  ;;  %1219 = vmatpush.msra.mxu1 %v729_v2  ;;  %v658_v0 = vld [vmem:[%s2450_s29 + $0x1c8] sm:$0xff]  ;;  %v409_v2 = vadd.f32 %v408_v54, %v407_v44 }
  0x80   : > { %1305 = vmatpush.msrb.mxu2 %v970_v3  ;;  %1264 = vmatpush.msrb.mxu0 %v722_v4  ;;  %v464_v3 = vrot.slane %v463_v55, 4  ;;  %v492_v4 = vrot.slane %v491_v56, 4  ;;  %v626_v44 = vld [vmem:[%s2450_s29 + $0xc8] sm:$0xff] }
  0x81   : > { %1284 = vmatpush.msrb.mxu1 %v850_v5  ;;  %1325 = vmatpush.msrb.mxu3 %v1098_v6  ;;  %v786_v5 = vld [vmem:[%s2450_s29 + $0x5c8] sm:$0xff] }
  0x82   : > { %1306 = vmatpush.msrb.mxu2 %v962_v7  ;;  %1265 = vmatpush.msrb.mxu0 %v714_v8  ;;  %v1034_v6 = vld [vmem:[%s2450_s29 + $0xd88] sm:$0xff]  ;;  %v354_v7 = vrot.slane %v353_v60, 2  ;;  %v437_v8 = vadd.f32 %v436_v61, %v435_v49 }
  0x83   : > { %1285 = vmatpush.msrb.mxu1 %v842_v9  ;;  %1326 = vmatpush.msrb.mxu3 %v1090_v10  ;;  %v520_v9 = vrot.slane %v519_v62, 4  ;;  %v547_v10 = vadd.f32 %v335_v59, %v331_v52  ;;  %v618_v52 = vld [vmem:[%s2450_s29 + $0x88] sm:$0xff] }
  0x84   : > { %1307 = vmatpush.msrb.mxu2 %v954_v11  ;;  %1266 = vmatpush.msrb.mxu0 %v706_v12  ;;  %v898_v11 = vld [vmem:[%s2450_s29 + $0x948] sm:$0xff] }
  0x85   : > { %1286 = vmatpush.msrb.mxu1 %v834_v13  ;;  %1327 = vmatpush.msrb.mxu3 %v1082_v14  ;;  %v650_v12 = vld [vmem:[%s2450_s29 + $0x188] sm:$0xff]  ;;  %v382_v13 = vrot.slane %v381_v1, 2  ;;  %v410_v14 = vrot.slane %v409_v2, 2 }
  0x86   : > { %1308 = vmatpush.msrb.mxu2 %v946_v15  ;;  %1267 = vmatpush.msrb.mxu0 %v698_v16  ;;  %v465_v15 = vadd.f32 %v464_v3, %v463_v55  ;;  %v493_v16 = vadd.f32 %v492_v4, %v491_v56  ;;  %v746_v59 = vld [vmem:[%s2450_s29 + $0x488] sm:$0xff] }
  0x87   : > { %1287 = vmatpush.msrb.mxu1 %v826_v17  ;;  %1328 = vmatpush.msrb.mxu3 %v1074_v19  ;;  %v778_v17 = vld [vmem:[%s2450_s29 + $0x588] sm:$0xff]  ;;  %v355_v19 = vadd.f32 %v354_v7, %v353_v60 }
  0x88   : > { %1309 = vmatpush.msrb.mxu2 %v938_v18  ;;  %1268 = vmatpush.msrb.mxu0 %v690_v20  ;;  %v1026_v18 = vld [vmem:[%s2450_s29 + $0xd48] sm:$0xff]  ;;  %v438_v20 = vrot.slane %v437_v8, 2  ;;  %v494_v29 = vrot.slane %v493_v16, 2 }
  0x89   : > { %1288 = vmatpush.msrb.mxu1 %v818_v21  ;;  %1329 = vmatpush.msrb.mxu3 %v1066_v23  ;;  %v521_v21 = vadd.f32 %v520_v9, %v519_v62  ;;  %v890_v23 = vld [vmem:[%s2450_s29 + $0x908] sm:$0xff] }
  0x8a   : > { %1310 = vmatpush.msrb.mxu2 %v930_v22  ;;  %1269 = vmatpush.msrb.mxu0 %v682_v24  ;;  %v548_v22 = vrot.slane %v547_v10, 4  ;;  %v642_v24 = vld [vmem:[%s2450_s29 + $0x148] sm:$0xff]  ;;  %v439_v34 = vadd.f32 %v438_v20, %v437_v8  ;;  %v495_v43 = vadd.f32 %v494_v29, %v493_v16  ;;  %v292_v8 = vld [vmem:[%s2443_s23 + $0x98] sm:$0xff] }
  0x8b   : > { %1289 = vmatpush.msrb.mxu1 %v810_v25  ;;  %1330 = vmatpush.msrb.mxu3 %v1058_v26  ;;  %v770_v25 = vld [vmem:[%s2450_s29 + $0x548] sm:$0xff]  ;;  %v383_v26 = vadd.f32 %v382_v13, %v381_v1  ;;  %v522_v35 = vrot.slane %v521_v21, 2  ;;  %v288_v1 = vld [vmem:[%s2443_s23 + $0x78] sm:$0xff] }
  0x8c   : > { %1311 = vmatpush.msrb.mxu2 %v922_v27  ;;  %1270 = vmatpush.msrb.mxu0 %v674_v28  ;;  %v411_v27 = vadd.f32 %v410_v14, %v409_v2  ;;  %v466_v28 = vrot.slane %v465_v15, 2  ;;  %v549_v36 = vadd.f32 %v548_v22, %v547_v10  ;;  %v440_v48 = vrot.slane %v439_v34, 1  ;;  %v858_v2 = vld [vmem:[%s2450_s29 + $0x808] sm:$0xff]  ;;  %v300_v13 = vld [vmem:[%s2443_s23 + $0xd8] sm:$0xff] }
  0x8d   : > { %1290 = vmatpush.msrb.mxu1 %v802_v32  ;;  %1331 = vmatpush.msrb.mxu3 %v1050_v33  ;;  %v634_v32 = vld [vmem:[%s2450_s29 + $0x108] sm:$0xff]  ;;  %v356_v33 = vrot.slane %v355_v19, 1  ;;  %v384_v40 = vrot.slane %v383_v26, 1  ;;  %v523_v49 = vadd.f32 %v522_v35, %v521_v21  ;;  %v496_v56 = vrot.slane %v495_v43, 1  ;;  %v304_v14 = vld [vmem:[%s2443_s23 + $0xf8] sm:$0xff] }
  0x8e   : > { %1312 = vmatpush.msrb.mxu2 %v914_v38  ;;  %1271 = vmatpush.msrb.mxu0 %v666_v39  ;;  %v874_v38 = vld [vmem:[%s2450_s29 + $0x888] sm:$0xff]  ;;  %v412_v41 = vrot.slane %v411_v27, 1  ;;  %v467_v42 = vadd.f32 %v466_v28, %v465_v15  ;;  %v550_v50 = vrot.slane %v549_v36, 2  ;;  %v441_v60 = vadd.f32 %v440_v48, %v439_v34  ;;  %v308_v20 = vld [vmem:[%s2443_s23 + $0x118] sm:$0xff]  ;;  %v979_v48 = vld [vmem:[%s2450_s29 + $0xbd0] sm:$0xff] }
  0x8f   : > { %1291 = vmatpush.msrb.mxu1 %v794_v57  ;;  %1332 = vmatpush.msrb.mxu3 %v1042_v58  ;;  %v1010_v39 = vld [vmem:[%s2450_s29 + $0xcc8] sm:$0xff]  ;;  %v357_v47 = vadd.f32 %v356_v33, %v355_v19  ;;  %v385_v53 = vadd.f32 %v384_v40, %v383_v26  ;;  %v276_v57 = vld [vmem:[%s2443_s23 + $0x18] sm:$0xff]  ;;  %v524_v61 = vrot.slane %v523_v49, 1  ;;  %v442_v34 = vadd.f32 %v304_v14, %v300_v13 }
  0x90   : > { %1313 = vmatpush.msrb.mxu2 %v906_v63  ;;  %1272 = vmatpush.msrb.mxu0 %v658_v0  ;;  %v413_v54 = vadd.f32 %v412_v41, %v411_v27  ;;  %v468_v55 = vrot.slane %v467_v42, 1  ;;  %v280_v58 = vld [vmem:[%s2443_s23 + $0x38] sm:$0xff]  ;;  %v551_v62 = vadd.f32 %v550_v50, %v549_v36  ;;  %v994_v3 = vld [vmem:[%s2450_s29 + $0xc48] sm:$0xff] }
  0x91   : > { %1292 = vmatpush.msrb.mxu1 %v786_v5  ;;  %1333 = vmatpush.msrb.mxu3 %v1034_v6  ;;  %v563_v63 = vmul.f32 0.0625, %v357_v47  ;;  %v284_v0 = vld [vmem:[%s2443_s23 + $0x58] sm:$0xff]  ;;  %v497_v5 = vadd.f32 %v496_v56, %v495_v43  ;;  %v567_v6 = vmul.f32 0.0625, %v385_v53  ;;  %v525_v9 = vadd.f32 %v524_v61, %v523_v49  ;;  %v610_v19 = vld [vmem:[%s2450_s29 + $0x48] sm:$0xff] }
  0x92   : > { %1314 = vmatpush.msrb.mxu2 %v898_v11  ;;  %1273 = vmatpush.msrb.mxu0 %v650_v12  ;;  %v469_v4 = vadd.f32 %v468_v55, %v467_v42  ;;  %v571_v7 = vmul.f32 0.0625, %v413_v54  ;;  %v552_v10 = vrot.slane %v551_v62, 1  ;;  %v575_v11 = vmul.f32 0.0625, %v441_v60  ;;  %v296_v12 = vld [vmem:[%s2443_s23 + $0xb8] sm:$0xff]  ;;  %v738_v26 = vld [vmem:[%s2450_s29 + $0x448] sm:$0xff] }
  0x93   : > { %1293 = vmatpush.msrb.mxu1 %v778_v17  ;;  %1334 = vmatpush.msrb.mxu3 %v1026_v18  ;;  %v358_v15 = vadd.f32 %v280_v58, %v276_v57  ;;  %v583_v17 = vmul.f32 0.0625, %v497_v5  ;;  %v1166_v18 = vsel %vm1145_vm0, %v567_v6, %v563_v63  ;;  %v312_v21 = vld [vmem:[%s2443_s23 + $0x138] sm:$0xff]  ;;  %v386_v22 = vadd.f32 %v288_v1, %v284_v0  ;;  %v986_v27 = vld [vmem:[%s2450_s29 + $0xc08] sm:$0xff] }
  0x94   : > { %1315 = vmatpush.msrb.mxu2 %v890_v23  ;;  %1274 = vmatpush.msrb.mxu0 %v642_v24  ;;  %v579_v16 = vmul.f32 0.0625, %v469_v4  ;;  %v553_v23 = vadd.f32 %v552_v10, %v551_v62  ;;  %v587_v24 = vmul.f32 0.0625, %v525_v9  ;;  %v414_v33 = vadd.f32 %v296_v12, %v292_v8  ;;  %v602_v35 = vld [vmem:[%s2450_s29 + $0x8] sm:$0xff]  ;;  %v324_v42 = vld [vmem:[%s2443_s23 + $0x198] sm:$0xff]  ;;  %v971_v62 = vld [vmem:[%s2450_s29 + $0xb90] sm:$0xff] }
  0x95   : > { %1294 = vmatpush.msrb.mxu1 %v770_v25  ;;  %1335 = vmatpush.msrb.mxu3 %v1018_v31  ;;  %v1167_v25 = vsel %vm1147_vm1, %v571_v7, %v1166_v18  ;;  %v359_v28 = vrot.slane %v358_v15, 4  ;;  %v320_v31 = vld [vmem:[%s2443_s23 + $0x178] sm:$0xff]  ;;  %v730_v40 = vld [vmem:[%s2450_s29 + $0x408] sm:$0xff] }
  0x96   : > { %1316 = vmatpush.msrb.mxu2 %v882_v30  ;;  %1275 = vmatpush.msrb.mxu0 %v634_v32  ;;  %v1168_v29 = vsel %vm1149_vm2, %v575_v11, %v1167_v25  ;;  %v316_v30 = vld [vmem:[%s2443_s23 + $0x158] sm:$0xff]  ;;  %v387_v32 = vrot.slane %v386_v22, 4  ;;  %v591_v36 = vmul.f32 0.0625, %v553_v23 }
  0x97   : > { %1295 = vmatpush.msrb.mxu1 %v762_v37  ;;  %1336 = vmatpush.msrb.mxu3 %v1010_v39  ;;  %v1169_v37 = vsel %vm1151_vm3, %v579_v16, %v1168_v29  ;;  %v470_v39 = vadd.f32 %v312_v21, %v308_v20  ;;  %v328_v43 = vld [vmem:[%s2443_s23 + $0x1b8] sm:$0xff]  ;;  %v498_v53 = vadd.f32 %v320_v31, %v316_v30  ;;  %v277_v20 = vld [vmem:[%s2443_s23 + $0x20] sm:$0xff] }
  0x98   : > { %1317 = vmatpush.msrb.mxu2 %v874_v38  ;;  %1276 = vmatpush.msrb.mxu0 %v626_v44  ;;  %v360_v38 = vadd.f32 %v359_v28, %v358_v15  ;;  %v1170_v41 = vsel %vm1153_vm4, %v583_v17, %v1169_v37  ;;  %v388_v44 = vadd.f32 %v387_v32, %v386_v22  ;;  %v332_v49 = vld [vmem:[%s2443_s23 + $0x1d8] sm:$0xff]  ;;  %v281_v29 = vld [vmem:[%s2443_s23 + $0x40] sm:$0xff] }
  0x99   : > { %1296 = vmatpush.msrb.mxu1 %v754_v45  ;;  %1337 = vmatpush.msrb.mxu3 %v1002_v46  ;;  %v415_v45 = vrot.slane %v414_v33, 4  ;;  %v443_v46 = vrot.slane %v442_v34, 4  ;;  %v1171_v47 = vsel %vm1155_vm5, %v587_v24, %v1170_v41  ;;  %v336_v50 = vld [vmem:[%s2443_s23 + $0x1f8] sm:$0xff]  ;;  %v499_v60 = vrot.slane %v498_v53, 4 }
  0x9a   : > { %1318 = vmatpush.msrb.mxu2 %v866_v51  ;;  %1277 = vmatpush.msrb.mxu0 %v618_v52  ;;  %v361_v51 = vrot.slane %v360_v38, 2  ;;  %v471_v52 = vrot.slane %v470_v39, 4  ;;  %v2629_v54 = vsel %vm1157_vm6, %v591_v36, %v1171_v47  ;;  %v389_v55 = vrot.slane %v388_v44, 2  ;;  %v297_v47 = vld [vmem:[%s2443_s23 + $0xc0] sm:$0xff] }
  0x9b   : > { %1297 = vmatpush.msrb.mxu1 %v746_v59  ;;  %1338 = vmatpush.msrb.mxu3 %v994_v3  ;;  %v416_v56 = vadd.f32 %v415_v45, %v414_v33  ;;  %v444_v57 = vadd.f32 %v443_v46, %v442_v34  ;;  %v526_v61 = vadd.f32 %v328_v43, %v324_v42  ;;  %v285_v33 = vld [vmem:[%s2443_s23 + $0x60] sm:$0xff] }
  0x9c   : > { %1319 = vmatpush.msrb.mxu2 %v858_v2  ;;  %1278 = vmatpush.msrb.mxu0 %v610_v19  ;;  %v362_v58 = vadd.f32 %v361_v51, %v360_v38  ;;  %v472_v59 = vadd.f32 %v471_v52, %v470_v39  ;;  %v390_v63 = vadd.f32 %v389_v55, %v388_v44  ;;  %v273_v19 = vld [vmem:[%s2443_s23] sm:$0xff] }
  0x9d   : > { %1298 = vmatpush.msrb.mxu1 %v738_v26  ;;  %1339 = vmatpush.msrb.mxu3 %v986_v27  ;;  %v417_v0 = vrot.slane %v416_v56, 2  ;;  %v445_v1 = vrot.slane %v444_v57, 2  ;;  %v554_v2 = vadd.f32 %v336_v50, %v332_v49  ;;  %v500_v5 = vadd.f32 %v499_v60, %v498_v53  ;;  %v289_v34 = vld [vmem:[%s2443_s23 + $0x80] sm:$0xff] }
  0x9e   : > { %1279 = vmatpush.msrb.mxu0 %v602_v35  ;;  %1240 = vmatmul.f32.vlgmr.msra.gmra.mxu2 %v2629_v54  ;;  %v363_v3 = vrot.slane %v362_v58, 1  ;;  %v473_v4 = vrot.slane %v472_v59, 2  ;;  %v527_v6 = vrot.slane %v526_v61, 4  ;;  %v391_v7 = vrot.slane %v390_v63, 1  ;;  %v293_v35 = vld [vmem:[%s2443_s23 + $0xa0] sm:$0xff] }
  0x9f   : > { %1299 = vmatpush.msrb.mxu1 %v730_v40  ;;  %1384 = vmatpush.msra.mxu2 %v979_v48  ;;  %v418_v8 = vadd.f32 %v417_v0, %v416_v56  ;;  %v446_v9 = vadd.f32 %v445_v1, %v444_v57  ;;  %v555_v10 = vrot.slane %v554_v2, 4  ;;  %v501_v13 = vrot.slane %v500_v5, 2  ;;  %v301_v48 = vld [vmem:[%s2443_s23 + $0xe0] sm:$0xff] }
  0xa0   : > { %v364_v11 = vadd.f32 %v363_v3, %v362_v58  ;;  %v474_v12 = vadd.f32 %v473_v4, %v472_v59  ;;  %v528_v14 = vadd.f32 %v527_v6, %v526_v61  ;;  %v392_v15 = vadd.f32 %v391_v7, %v390_v63  ;;  %v305_v55 = vld [vmem:[%s2443_s23 + $0x100] sm:$0xff] }
  0xa1   : > { %1385 = vmatpush.msra.mxu2 %v971_v62  ;;  %v419_v16 = vrot.slane %v418_v8, 1  ;;  %v447_v17 = vrot.slane %v446_v9, 1  ;;  %v556_v18 = vadd.f32 %v555_v10, %v554_v2  ;;  %v502_v22 = vadd.f32 %v501_v13, %v500_v5  ;;  %v309_v56 = vld [vmem:[%s2443_s23 + $0x120] sm:$0xff] }
  0xa2   : > { %v475_v21 = vrot.slane %v474_v12, 1  ;;  %v529_v23 = vrot.slane %v528_v14, 2  ;;  %v564_v24 = vmul.f32 0.0625, %v364_v11  ;;  %v568_v28 = vmul.f32 0.0625, %v392_v15  ;;  %v313_v60 = vld [vmem:[%s2443_s23 + $0x140] sm:$0xff]  ;;  %v1107_v11 = vld [vmem:[%s2450_s29 + $0xfd0] sm:$0xff] }
  0xa3   : > { %v420_v25 = vadd.f32 %v419_v16, %v418_v8  ;;  %v448_v26 = vadd.f32 %v447_v17, %v446_v9  ;;  %v557_v27 = vrot.slane %v556_v18, 2  ;;  %v503_v31 = vrot.slane %v502_v22, 1  ;;  %v317_v61 = vld [vmem:[%s2443_s23 + $0x160] sm:$0xff] }
  0xa4   : > { %v476_v30 = vadd.f32 %v475_v21, %v474_v12  ;;  %v530_v32 = vadd.f32 %v529_v23, %v528_v14  ;;  %v337_v36 = vadd.f32 %v277_v20, %v273_v19  ;;  %v1173_v40 = vsel %vm1145_vm0, %v568_v28, %v564_v24  ;;  %v321_v5 = vld [vmem:[%s2443_s23 + $0x180] sm:$0xff] }
  0xa5   : > { %v558_v37 = vadd.f32 %v557_v27, %v556_v18  ;;  %v572_v38 = vmul.f32 0.0625, %v420_v25  ;;  %v576_v39 = vmul.f32 0.0625, %v448_v26  ;;  %v504_v41 = vadd.f32 %v503_v31, %v502_v22  ;;  %v325_v6 = vld [vmem:[%s2443_s23 + $0x1a0] sm:$0xff] }
  0xa6   : > { %1320 = vmatmul.f32.vlgmr.msrb.gmra.mxu2 %v2629_v54  ;;  %v531_v42 = vrot.slane %v530_v32, 1  ;;  %v580_v43 = vmul.f32 0.0625, %v476_v30  ;;  %v338_v44 = vrot.slane %v337_v36, 4  ;;  %v365_v49 = vadd.f32 %v285_v33, %v281_v29  ;;  %v329_v12 = vld [vmem:[%s2443_s23 + $0x1c0] sm:$0xff] }
  0xa7   : > { %v559_v45 = vrot.slane %v558_v37, 1  ;;  %v1174_v46 = vsel %vm1147_vm1, %v572_v38, %v1173_v40  ;;  %v393_v50 = vadd.f32 %v293_v35, %v289_v34  ;;  %v584_v52 = vmul.f32 0.0625, %v504_v41  ;;  %v333_v13 = vld [vmem:[%s2443_s23 + $0x1e0] sm:$0xff]  ;;  %v278_v38 = vld [vmem:[%s2443_s23 + $0x28] sm:$0xff] }
  0xa8   : > { %v532_v51 = vadd.f32 %v531_v42, %v530_v32  ;;  %v1175_v53 = vsel %vm1149_vm2, %v576_v39, %v1174_v46  ;;  %v339_v57 = vadd.f32 %v338_v44, %v337_v36  ;;  %v366_v62 = vrot.slane %v365_v49, 4  ;;  %v1099_v44 = vld [vmem:[%s2450_s29 + $0xf90] sm:$0xff] }
  0xa9   : > { %v560_v58 = vadd.f32 %v559_v45, %v558_v37  ;;  %v1176_v59 = vsel %vm1151_vm3, %v580_v43, %v1175_v53  ;;  %v394_v63 = vrot.slane %v393_v50, 4  ;;  %v421_v3 = vadd.f32 %v301_v48, %v297_v47  ;;  %v274_v37 = vld [vmem:[%s2443_s23 + $0x8] sm:$0xff]  ;;  %v963_v43 = vld [vmem:[%s2450_s29 + $0xb50] sm:$0xff] }
  0xaa   : > { %v588_v0 = vmul.f32 0.0625, %v532_v51  ;;  %v1177_v1 = vsel %vm1153_vm4, %v584_v52, %v1176_v59  ;;  %v340_v2 = vrot.slane %v339_v57, 2  ;;  %v367_v7 = vadd.f32 %v366_v62, %v365_v49  ;;  %v282_v49 = vld [vmem:[%s2443_s23 + $0x48] sm:$0xff]  ;;  %1386 = vmatpush.msra.mxu2 %v963_v43  ;;  %v1059_v43 = vld [vmem:[%s2450_s29 + $0xe50] sm:$0xff] }
  0xab   : > { %v592_v4 = vmul.f32 0.0625, %v560_v58  ;;  %v395_v8 = vadd.f32 %v394_v63, %v393_v50  ;;  %v449_v9 = vadd.f32 %v309_v56, %v305_v55  ;;  %v422_v15 = vrot.slane %v421_v3, 4  ;;  %v286_v53 = vld [vmem:[%s2443_s23 + $0x68] sm:$0xff]  ;;  %v955_v56 = vld [vmem:[%s2450_s29 + $0xb10] sm:$0xff] }
  0xac   : > { %v1178_v10 = vsel %vm1155_vm5, %v588_v0, %v1177_v1  ;;  %v341_v14 = vadd.f32 %v340_v2, %v339_v57  ;;  %v477_v16 = vadd.f32 %v317_v61, %v313_v60  ;;  %v368_v18 = vrot.slane %v367_v7, 2  ;;  %v1091_v57 = vld [vmem:[%s2450_s29 + $0xf50] sm:$0xff]  ;;  %1387 = vmatpush.msra.mxu2 %v955_v56 }
  0xad   : > { %v2658_v17 = vsel %vm1157_vm6, %v592_v4, %v1178_v10  ;;  %v396_v19 = vrot.slane %v395_v8, 2  ;;  %v450_v20 = vrot.slane %v449_v9, 4  ;;  %v423_v22 = vadd.f32 %v422_v15, %v421_v3  ;;  %v947_v2 = vld [vmem:[%s2450_s29 + $0xad0] sm:$0xff] }
  0xae   : > { %1260 = vmatmul.f32.vlgmr.msra.gmra.mxu3 %v2658_v17  ;;  %v342_v21 = vrot.slane %v341_v14, 1  ;;  %v478_v23 = vrot.slane %v477_v16, 4  ;;  %v505_v24 = vadd.f32 %v325_v6, %v321_v5  ;;  %v369_v25 = vadd.f32 %v368_v18, %v367_v7  ;;  %v1083_v3 = vld [vmem:[%s2450_s29 + $0xf10] sm:$0xff]  ;;  %v290_v7 = vld [vmem:[%s2443_s23 + $0x88] sm:$0xff]  ;;  %1388 = vmatpush.msra.mxu2 %v947_v2 }
  0xaf   : > { %1404 = vmatpush.msra.mxu3 %v1107_v11  ;;  %v397_v26 = vadd.f32 %v396_v19, %v395_v8  ;;  %v451_v27 = vadd.f32 %v450_v20, %v449_v9  ;;  %v533_v28 = vadd.f32 %v333_v13, %v329_v12  ;;  %v424_v30 = vrot.slane %v423_v22, 2  ;;  %v294_v8 = vld [vmem:[%s2443_s23 + $0xa8] sm:$0xff]  ;;  %v1075_v15 = vld [vmem:[%s2450_s29 + $0xed0] sm:$0xff] }
  0xb0   : > { %v343_v29 = vadd.f32 %v342_v21, %v341_v14  ;;  %v479_v31 = vadd.f32 %v478_v23, %v477_v16  ;;  %v506_v32 = vrot.slane %v505_v24, 4  ;;  %v370_v33 = vrot.slane %v369_v25, 1  ;;  %v939_v14 = vld [vmem:[%s2450_s29 + $0xa90] sm:$0xff]  ;;  %v298_v19 = vld [vmem:[%s2443_s23 + $0xc8] sm:$0xff] }
  0xb1   : > { %v398_v34 = vrot.slane %v397_v26, 1  ;;  %v452_v35 = vrot.slane %v451_v27, 2  ;;  %v534_v36 = vrot.slane %v533_v28, 4  ;;  %v425_v39 = vadd.f32 %v424_v30, %v423_v22  ;;  %1405 = vmatpush.msra.mxu3 %v1099_v44  ;;  %v302_v20 = vld [vmem:[%s2443_s23 + $0xe8] sm:$0xff]  ;;  %1389 = vmatpush.msra.mxu2 %v939_v14  ;;  %v1067_v30 = vld [vmem:[%s2450_s29 + $0xe90] sm:$0xff] }
  0xb2   : > { %v480_v40 = vrot.slane %v479_v31, 2  ;;  %v507_v41 = vadd.f32 %v506_v32, %v505_v24  ;;  %v561_v42 = vmul.f32 0.0625, %v343_v29  ;;  %v371_v45 = vadd.f32 %v370_v33, %v369_v25  ;;  %v306_v21 = vld [vmem:[%s2443_s23 + $0x108] sm:$0xff]  ;;  %v931_v29 = vld [vmem:[%s2450_s29 + $0xa50] sm:$0xff] }
  0xb3   : > { %v399_v46 = vadd.f32 %v398_v34, %v397_v26  ;;  %v453_v47 = vadd.f32 %v452_v35, %v451_v27  ;;  %v535_v48 = vadd.f32 %v534_v36, %v533_v28  ;;  %v426_v50 = vrot.slane %v425_v39, 1  ;;  %1406 = vmatpush.msra.mxu3 %v1091_v57  ;;  %v310_v27 = vld [vmem:[%s2443_s23 + $0x128] sm:$0xff]  ;;  %1390 = vmatpush.msra.mxu2 %v931_v29  ;;  %v723_v56 = vld [vmem:[%s2450_s29 + $0x3d0] sm:$0xff] }
  0xb4   : > { %v481_v51 = vadd.f32 %v480_v40, %v479_v31  ;;  %v508_v52 = vrot.slane %v507_v41, 2  ;;  %v344_v55 = vadd.f32 %v278_v38, %v274_v37  ;;  %v565_v60 = vmul.f32 0.0625, %v371_v45  ;;  %v314_v33 = vld [vmem:[%s2443_s23 + $0x148] sm:$0xff]  ;;  %v915_v57 = vld [vmem:[%s2450_s29 + $0x9d0] sm:$0xff] }
  0xb5   : > { %v454_v58 = vrot.slane %v453_v47, 1  ;;  %v536_v59 = vrot.slane %v535_v48, 2  ;;  %v569_v61 = vmul.f32 0.0625, %v399_v46  ;;  %v427_v62 = vadd.f32 %v426_v50, %v425_v39  ;;  %1407 = vmatpush.msra.mxu3 %v1083_v3  ;;  %v318_v34 = vld [vmem:[%s2443_s23 + $0x168] sm:$0xff]  ;;  %v715_v3 = vld [vmem:[%s2450_s29 + $0x390] sm:$0xff] }
  0xb6   : > { %v482_v63 = vrot.slane %v481_v51, 1  ;;  %v509_v0 = vadd.f32 %v508_v52, %v507_v41  ;;  %v345_v1 = vrot.slane %v344_v55, 4  ;;  %v1146_v6 = vsel %vm1145_vm0, %v565_v60, %v561_v42  ;;  %1340 = vmatmul.f32.vlgmr.msrb.gmra.mxu3 %v2658_v17  ;;  %v322_v39 = vld [vmem:[%s2443_s23 + $0x188] sm:$0xff]  ;;  %v923_v42 = vld [vmem:[%s2450_s29 + $0xa10] sm:$0xff] }
  0xb7   : > { %v455_v4 = vadd.f32 %v454_v58, %v453_v47  ;;  %v537_v5 = vadd.f32 %v536_v59, %v535_v48  ;;  %v372_v9 = vadd.f32 %v286_v53, %v282_v49  ;;  %v573_v12 = vmul.f32 0.0625, %v427_v62  ;;  %1408 = vmatpush.msra.mxu3 %v1075_v15  ;;  %v326_v45 = vld [vmem:[%s2443_s23 + $0x1a8] sm:$0xff]  ;;  %1391 = vmatpush.msra.mxu2 %v923_v42  ;;  %v1051_v58 = vld [vmem:[%s2450_s29 + $0xe10] sm:$0xff] }
  0xb8   : > { %v483_v10 = vadd.f32 %v482_v63, %v481_v51  ;;  %v510_v11 = vrot.slane %v509_v0, 1  ;;  %v1148_v13 = vsel %vm1147_vm1, %v569_v61, %v1146_v6  ;;  %v346_v22 = vadd.f32 %v345_v1, %v344_v55  ;;  %v330_v46 = vld [vmem:[%s2443_s23 + $0x1c8] sm:$0xff]  ;;  %v707_v14 = vld [vmem:[%s2450_s29 + $0x350] sm:$0xff] }
  0xb9   : > { %v538_v16 = vrot.slane %v537_v5, 1  ;;  %v577_v18 = vmul.f32 0.0625, %v455_v4  ;;  %v373_v23 = vrot.slane %v372_v9, 4  ;;  %v1150_v26 = vsel %vm1149_vm2, %v573_v12, %v1148_v13  ;;  %1409 = vmatpush.msra.mxu3 %v1067_v30  ;;  %v334_v47 = vld [vmem:[%s2443_s23 + $0x1e8] sm:$0xff]  ;;  %1392 = vmatpush.msra.mxu2 %v915_v57  ;;  %v907_v4 = vld [vmem:[%s2450_s29 + $0x990] sm:$0xff] }
  0xba   : > { %v511_v24 = vadd.f32 %v510_v11, %v509_v0  ;;  %v581_v25 = vmul.f32 0.0625, %v483_v10  ;;  %v400_v28 = vadd.f32 %v294_v8, %v290_v7  ;;  %v347_v35 = vrot.slane %v346_v22, 2  ;;  %v899_v15 = vld [vmem:[%s2450_s29 + $0x950] sm:$0xff] }
  0xbb   : > { %v539_v31 = vadd.f32 %v538_v16, %v537_v5  ;;  %v1152_v32 = vsel %vm1151_vm3, %v577_v18, %v1150_v26  ;;  %v374_v36 = vadd.f32 %v373_v23, %v372_v9  ;;  %v428_v41 = vadd.f32 %v302_v20, %v298_v19  ;;  %1410 = vmatpush.msra.mxu3 %v1059_v43  ;;  %v1043_v5 = vld [vmem:[%s2450_s29 + $0xdd0] sm:$0xff] }
  0xbc   : > { %v585_v37 = vmul.f32 0.0625, %v511_v24  ;;  %v1154_v38 = vsel %vm1153_vm4, %v581_v25, %v1152_v32  ;;  %v401_v40 = vrot.slane %v400_v28, 4  ;;  %v348_v48 = vadd.f32 %v347_v35, %v346_v22  ;;  %1393 = vmatpush.msra.mxu2 %v907_v4  ;;  %v1035_v16 = vld [vmem:[%s2450_s29 + $0xd90] sm:$0xff] }
  0xbd   : > { %v589_v44 = vmul.f32 0.0625, %v539_v31  ;;  %v375_v49 = vrot.slane %v374_v36, 2  ;;  %v456_v50 = vadd.f32 %v310_v27, %v306_v21  ;;  %v429_v53 = vrot.slane %v428_v41, 4  ;;  %1411 = vmatpush.msra.mxu3 %v1051_v58  ;;  %v699_v26 = vld [vmem:[%s2450_s29 + $0x310] sm:$0xff] }
  0xbe   : > { %v1156_v51 = vsel %vm1155_vm5, %v585_v37, %v1154_v38  ;;  %v402_v52 = vadd.f32 %v401_v40, %v400_v28  ;;  %v484_v55 = vadd.f32 %v318_v34, %v314_v33  ;;  %v349_v60 = vrot.slane %v348_v48, 1  ;;  %1394 = vmatpush.msra.mxu2 %v899_v15  ;;  %v891_v27 = vld [vmem:[%s2450_s29 + $0x910] sm:$0xff] }
  0xbf   : > { %v2700_v59 = vsel %vm1157_vm6, %v589_v44, %v1156_v51  ;;  %v376_v61 = vadd.f32 %v375_v49, %v374_v36  ;;  %v457_v62 = vrot.slane %v456_v50, 4  ;;  %v430_v0 = vadd.f32 %v429_v53, %v428_v41  ;;  %1412 = vmatpush.msra.mxu3 %v1043_v5  ;;  %v1027_v28 = vld [vmem:[%s2450_s29 + $0xd50] sm:$0xff] }
  0xc0   : > { %1200 = vmatmul.f32.vlgmr.msra.gmra.mxu0 %v2700_v59  ;;  %v403_v63 = vrot.slane %v402_v52, 2  ;;  %v485_v1 = vrot.slane %v484_v55, 4  ;;  %v512_v2 = vadd.f32 %v326_v45, %v322_v39  ;;  %v350_v6 = vadd.f32 %v349_v60, %v348_v48  ;;  %1395 = vmatpush.msra.mxu2 %v891_v27  ;;  %v691_v36 = vld [vmem:[%s2450_s29 + $0x2d0] sm:$0xff]  ;;  %v948_v27 = vld [vmem:[%s2450_s29 + $0xad8] sm:$0xff] }
  0xc1   : > { %v377_v7 = vrot.slane %v376_v61, 1  ;;  %v458_v8 = vadd.f32 %v457_v62, %v456_v50  ;;  %v540_v9 = vadd.f32 %v334_v47, %v330_v46  ;;  %1344 = vmatpush.msra.mxu0 %v723_v56  ;;  %v431_v11 = vrot.slane %v430_v0, 2  ;;  %1413 = vmatpush.msra.mxu3 %v1035_v16  ;;  %v883_v37 = vld [vmem:[%s2450_s29 + $0x8d0] sm:$0xff] }
  0xc2   : > { %v404_v10 = vadd.f32 %v403_v63, %v402_v52  ;;  %v486_v12 = vadd.f32 %v485_v1, %v484_v55  ;;  %v513_v13 = vrot.slane %v512_v2, 4  ;;  %v562_v21 = vmul.f32 0.0625, %v350_v6  ;;  %v1019_v38 = vld [vmem:[%s2450_s29 + $0xd10] sm:$0xff]  ;;  %1396 = vmatpush.msra.mxu2 %v883_v37  ;;  %v980_v6 = vld [vmem:[%s2450_s29 + $0xbd8] sm:$0xff] }
  0xc3   : > { %v378_v18 = vadd.f32 %v377_v7, %v376_v61  ;;  %v459_v19 = vrot.slane %v458_v8, 2  ;;  %v541_v20 = vrot.slane %v540_v9, 4  ;;  %1345 = vmatpush.msra.mxu0 %v715_v3  ;;  %v432_v23 = vadd.f32 %v431_v11, %v430_v0  ;;  %1414 = vmatpush.msra.mxu3 %v1027_v28  ;;  %v683_v46 = vld [vmem:[%s2450_s29 + $0x290] sm:$0xff]  ;;  %v1084_v28 = vld [vmem:[%s2450_s29 + $0xf18] sm:$0xff] }
  0xc4   : > { %v405_v22 = vrot.slane %v404_v10, 1  ;;  %v487_v24 = vrot.slane %v486_v12, 2  ;;  %v514_v25 = vadd.f32 %v513_v13, %v512_v2  ;;  %v875_v47 = vld [vmem:[%s2450_s29 + $0x890] sm:$0xff]  ;;  %v1108_v13 = vld [vmem:[%s2450_s29 + $0xfd8] sm:$0xff] }
  0xc5   : > { %v460_v29 = vadd.f32 %v459_v19, %v458_v8  ;;  %v542_v30 = vadd.f32 %v541_v20, %v540_v9  ;;  %v566_v31 = vmul.f32 0.0625, %v378_v18  ;;  %1346 = vmatpush.msra.mxu0 %v707_v14  ;;  %v433_v33 = vrot.slane %v432_v23, 1  ;;  %1415 = vmatpush.msra.mxu3 %v1019_v38  ;;  %v1011_v48 = vld [vmem:[%s2450_s29 + $0xcd0] sm:$0xff]  ;;  %v964_v19 = vld [vmem:[%s2450_s29 + $0xb58] sm:$0xff] }
  0xc6   : > { %v406_v32 = vadd.f32 %v405_v22, %v404_v10  ;;  %v488_v34 = vadd.f32 %v487_v24, %v486_v12  ;;  %v515_v35 = vrot.slane %v514_v25, 2  ;;  %1397 = vmatpush.msra.mxu2 %v875_v47  ;;  %v675_v56 = vld [vmem:[%s2450_s29 + $0x250] sm:$0xff]  ;;  %v972_v12 = vld [vmem:[%s2450_s29 + $0xb98] sm:$0xff] }
  0xc7   : > { %v461_v39 = vrot.slane %v460_v29, 1  ;;  %v543_v40 = vrot.slane %v542_v30, 2  ;;  %v1159_v41 = vsel %vm1145_vm0, %v566_v31, %v562_v21  ;;  %1347 = vmatpush.msra.mxu0 %v699_v26  ;;  %v434_v42 = vadd.f32 %v433_v33, %v432_v23  ;;  %1416 = vmatpush.msra.mxu3 %v1011_v48  ;;  %v867_v57 = vld [vmem:[%s2450_s29 + $0x850] sm:$0xff]  ;;  %v1100_v22 = vld [vmem:[%s2450_s29 + $0xf98] sm:$0xff] }
  0xc8   : > { %v489_v43 = vrot.slane %v488_v34, 1  ;;  %v516_v44 = vadd.f32 %v515_v35, %v514_v25  ;;  %v570_v45 = vmul.f32 0.0625, %v406_v32  ;;  %1280 = vmatmul.f32.vlgmr.msrb.gmra.mxu0 %v2700_v59  ;;  %v1003_v58 = vld [vmem:[%s2450_s29 + $0xc90] sm:$0xff]  ;;  %1398 = vmatpush.msra.mxu2 %v867_v57  ;;  %v956_v23 = vld [vmem:[%s2450_s29 + $0xb18] sm:$0xff] }
  0xc9   : > { %v462_v49 = vadd.f32 %v461_v39, %v460_v29  ;;  %v544_v50 = vadd.f32 %v543_v40, %v542_v30  ;;  %1348 = vmatpush.msra.mxu0 %v691_v36  ;;  %v574_v53 = vmul.f32 0.0625, %v434_v42  ;;  %v667_v1 = vld [vmem:[%s2450_s29 + $0x210] sm:$0xff]  ;;  %1417 = vmatpush.msra.mxu3 %v1003_v58  ;;  %v1092_v24 = vld [vmem:[%s2450_s29 + $0xf58] sm:$0xff] }
  0xca   : > { %v490_v51 = vadd.f32 %v489_v43, %v488_v34  ;;  %v517_v52 = vrot.slane %v516_v44, 1  ;;  %v1160_v55 = vsel %vm1147_vm1, %v570_v45, %v1159_v41  ;;  %v859_v2 = vld [vmem:[%s2450_s29 + $0x810] sm:$0xff]  ;;  %v940_v31 = vld [vmem:[%s2450_s29 + $0xa98] sm:$0xff] }
  0xcb   : > { %v545_v60 = vrot.slane %v544_v50, 1  ;;  %v578_v61 = vmul.f32 0.0625, %v462_v49  ;;  %1349 = vmatpush.msra.mxu0 %v683_v46  ;;  %v1161_v0 = vsel %vm1149_vm2, %v574_v53, %v1160_v55  ;;  %v995_v3 = vld [vmem:[%s2450_s29 + $0xc50] sm:$0xff]  ;;  %1399 = vmatpush.msra.mxu2 %v859_v2  ;;  %v1076_v32 = vld [vmem:[%s2450_s29 + $0xed8] sm:$0xff] }
  0xcc   : > { %v518_v62 = vadd.f32 %v517_v52, %v516_v44  ;;  %v582_v63 = vmul.f32 0.0625, %v490_v51  ;;  %v659_v9 = vld [vmem:[%s2450_s29 + $0x1d0] sm:$0xff]  ;;  %1418 = vmatpush.msra.mxu3 %v995_v3  ;;  %1400 = vmatmul.f32.vlgmr.msra.gmra.mxu2 %v2629_v54  ;;  %v932_v35 = vld [vmem:[%s2450_s29 + $0xa58] sm:$0xff] }
  0xcd   : > { %v546_v4 = vadd.f32 %v545_v60, %v544_v50  ;;  %v1162_v5 = vsel %vm1151_vm3, %v578_v61, %v1161_v0  ;;  %1350 = vmatpush.msra.mxu0 %v675_v56  ;;  %1464 = vmatpush.msrb.mxu2 %v980_v6  ;;  %v987_v10 = vld [vmem:[%s2450_s29 + $0xc10] sm:$0xff]  ;;  %v1068_v36 = vld [vmem:[%s2450_s29 + $0xe98] sm:$0xff] }
  0xce   : > { %v586_v7 = vmul.f32 0.0625, %v518_v62  ;;  %v1163_v8 = vsel %vm1153_vm4, %v582_v63, %v1162_v5  ;;  %v851_v15 = vld [vmem:[%s2450_s29 + $0x7d0] sm:$0xff]  ;;  %1419 = vmatpush.msra.mxu3 %v987_v10  ;;  %v924_v39 = vld [vmem:[%s2450_s29 + $0xa18] sm:$0xff] }
  0xcf   : > { %v590_v11 = vmul.f32 0.0625, %v546_v4  ;;  %1351 = vmatpush.msra.mxu0 %v667_v1  ;;  %v651_v16 = vld [vmem:[%s2450_s29 + $0x190] sm:$0xff]  ;;  %1465 = vmatpush.msrb.mxu2 %v972_v12  ;;  %v1060_v40 = vld [vmem:[%s2450_s29 + $0xe58] sm:$0xff] }
  0xd0   : > { %v1164_v14 = vsel %vm1155_vm5, %v586_v7, %v1163_v8  ;;  %1484 = vmatpush.msrb.mxu3 %v1108_v13  ;;  %v843_v20 = vld [vmem:[%s2450_s29 + $0x790] sm:$0xff]  ;;  %v724_v43 = vld [vmem:[%s2450_s29 + $0x3d8] sm:$0xff] }
  0xd1   : > { %v2740_v18 = vsel %vm1157_vm6, %v590_v11, %v1164_v14  ;;  %1352 = vmatpush.msra.mxu0 %v659_v9  ;;  %v643_v21 = vld [vmem:[%s2450_s29 + $0x150] sm:$0xff]  ;;  %1466 = vmatpush.msrb.mxu2 %v964_v19  ;;  %v916_v44 = vld [vmem:[%s2450_s29 + $0x9d8] sm:$0xff]  ;;  %v981_v14 = vld [vmem:[%s2450_s29 + $0xbe0] sm:$0xff] }
  0xd2   : > { %1220 = vmatmul.f32.vlgmr.msra.gmra.mxu1 %v2740_v18  ;;  %v835_v25 = vld [vmem:[%s2450_s29 + $0x750] sm:$0xff]  ;;  %1485 = vmatpush.msrb.mxu3 %v1100_v22  ;;  %v1052_v46 = vld [vmem:[%s2450_s29 + $0xe18] sm:$0xff] }
  0xd3   : > { %1364 = vmatpush.msra.mxu1 %v851_v15  ;;  %1353 = vmatpush.msra.mxu0 %v651_v16  ;;  %v635_v26 = vld [vmem:[%s2450_s29 + $0x110] sm:$0xff]  ;;  %v716_v47 = vld [vmem:[%s2450_s29 + $0x398] sm:$0xff] }
  0xd4   : > { %1467 = vmatpush.msrb.mxu2 %v956_v23  ;;  %v827_v29 = vld [vmem:[%s2450_s29 + $0x710] sm:$0xff]  ;;  %1486 = vmatpush.msrb.mxu3 %v1092_v24  ;;  %v908_v48 = vld [vmem:[%s2450_s29 + $0x998] sm:$0xff]  ;;  %v1109_v24 = vld [vmem:[%s2450_s29 + $0xfe0] sm:$0xff] }
  0xd5   : > { %1365 = vmatpush.msra.mxu1 %v843_v20  ;;  %1354 = vmatpush.msra.mxu0 %v643_v21  ;;  %v627_v30 = vld [vmem:[%s2450_s29 + $0xd0] sm:$0xff]  ;;  %v1044_v50 = vld [vmem:[%s2450_s29 + $0xdd8] sm:$0xff]  ;;  %v973_v21 = vld [vmem:[%s2450_s29 + $0xba0] sm:$0xff] }
  0xd6   : > { %1468 = vmatpush.msrb.mxu2 %v948_v27  ;;  %v819_v33 = vld [vmem:[%s2450_s29 + $0x6d0] sm:$0xff]  ;;  %1487 = vmatpush.msrb.mxu3 %v1084_v28  ;;  %v708_v51 = vld [vmem:[%s2450_s29 + $0x358] sm:$0xff]  ;;  %v965_v27 = vld [vmem:[%s2450_s29 + $0xb60] sm:$0xff] }
  0xd7   : > { %1366 = vmatpush.msra.mxu1 %v835_v25  ;;  %1355 = vmatpush.msra.mxu0 %v635_v26  ;;  %v619_v34 = vld [vmem:[%s2450_s29 + $0x90] sm:$0xff]  ;;  %v900_v52 = vld [vmem:[%s2450_s29 + $0x958] sm:$0xff] }
  0xd8   : > { %1469 = vmatpush.msrb.mxu2 %v940_v31  ;;  %v811_v37 = vld [vmem:[%s2450_s29 + $0x690] sm:$0xff]  ;;  %1488 = vmatpush.msrb.mxu3 %v1076_v32  ;;  %v1036_v55 = vld [vmem:[%s2450_s29 + $0xd98] sm:$0xff]  ;;  %v957_v31 = vld [vmem:[%s2450_s29 + $0xb20] sm:$0xff] }
  0xd9   : > { %1367 = vmatpush.msra.mxu1 %v827_v29  ;;  %1356 = vmatpush.msra.mxu0 %v627_v30  ;;  %v611_v38 = vld [vmem:[%s2450_s29 + $0x50] sm:$0xff]  ;;  %v700_v56 = vld [vmem:[%s2450_s29 + $0x318] sm:$0xff]  ;;  %v1101_v30 = vld [vmem:[%s2450_s29 + $0xfa0] sm:$0xff] }
  0xda   : > { %1300 = vmatmul.f32.vlgmr.msrb.gmra.mxu1 %v2740_v18  ;;  %v803_v41 = vld [vmem:[%s2450_s29 + $0x650] sm:$0xff]  ;;  %1470 = vmatpush.msrb.mxu2 %v932_v35  ;;  %v892_v57 = vld [vmem:[%s2450_s29 + $0x918] sm:$0xff]  ;;  %v949_v35 = vld [vmem:[%s2450_s29 + $0xae0] sm:$0xff] }
  0xdb   : > { %1368 = vmatpush.msra.mxu1 %v819_v33  ;;  %1357 = vmatpush.msra.mxu0 %v619_v34  ;;  %v603_v42 = vld [vmem:[%s2450_s29 + $0x10] sm:$0xff]  ;;  %v1028_v60 = vld [vmem:[%s2450_s29 + $0xd58] sm:$0xff]  ;;  %v1093_v34 = vld [vmem:[%s2450_s29 + $0xf60] sm:$0xff] }
  0xdc   : > { %1489 = vmatpush.msrb.mxu3 %v1068_v36  ;;  %v795_v45 = vld [vmem:[%s2450_s29 + $0x610] sm:$0xff]  ;;  %1471 = vmatpush.msrb.mxu2 %v924_v39  ;;  %v692_v61 = vld [vmem:[%s2450_s29 + $0x2d8] sm:$0xff]  ;;  %v941_v39 = vld [vmem:[%s2450_s29 + $0xaa0] sm:$0xff] }
  0xdd   : > { %1369 = vmatpush.msra.mxu1 %v811_v37  ;;  %1358 = vmatpush.msra.mxu0 %v611_v38  ;;  %v787_v49 = vld [vmem:[%s2450_s29 + $0x5d0] sm:$0xff]  ;;  %v884_v62 = vld [vmem:[%s2450_s29 + $0x8d8] sm:$0xff]  ;;  %v1085_v38 = vld [vmem:[%s2450_s29 + $0xf20] sm:$0xff] }
  0xde   : > { %1490 = vmatpush.msrb.mxu3 %v1060_v40  ;;  %1472 = vmatpush.msrb.mxu2 %v916_v44  ;;  %v779_v53 = vld [vmem:[%s2450_s29 + $0x590] sm:$0xff]  ;;  %v1020_v0 = vld [vmem:[%s2450_s29 + $0xd18] sm:$0xff] }
  0xdf   : > { %1370 = vmatpush.msra.mxu1 %v803_v41  ;;  %1359 = vmatpush.msra.mxu0 %v603_v42  ;;  %v771_v58 = vld [vmem:[%s2450_s29 + $0x550] sm:$0xff]  ;;  %v684_v1 = vld [vmem:[%s2450_s29 + $0x298] sm:$0xff]  ;;  %v725_v42 = vld [vmem:[%s2450_s29 + $0x3e0] sm:$0xff] }
  0xe0   : > { %1491 = vmatpush.msrb.mxu3 %v1052_v46  ;;  %1473 = vmatpush.msrb.mxu2 %v908_v48  ;;  %v763_v63 = vld [vmem:[%s2450_s29 + $0x510] sm:$0xff]  ;;  %v876_v2 = vld [vmem:[%s2450_s29 + $0x898] sm:$0xff]  ;;  %v717_v46 = vld [vmem:[%s2450_s29 + $0x3a0] sm:$0xff] }
  0xe1   : > { %1424 = vmatpush.msrb.mxu0 %v724_v43  ;;  %1371 = vmatpush.msra.mxu1 %v795_v45  ;;  %v755_v3 = vld [vmem:[%s2450_s29 + $0x4d0] sm:$0xff]  ;;  %v1012_v4 = vld [vmem:[%s2450_s29 + $0xcd8] sm:$0xff]  ;;  %v1077_v43 = vld [vmem:[%s2450_s29 + $0xee0] sm:$0xff] }
  0xe2   : > { %1492 = vmatpush.msrb.mxu3 %v1044_v50  ;;  %1474 = vmatpush.msrb.mxu2 %v900_v52  ;;  %v676_v5 = vld [vmem:[%s2450_s29 + $0x258] sm:$0xff]  ;;  %v747_v7 = vld [vmem:[%s2450_s29 + $0x490] sm:$0xff]  ;;  %v933_v45 = vld [vmem:[%s2450_s29 + $0xa60] sm:$0xff] }
  0xe3   : > { %1425 = vmatpush.msrb.mxu0 %v716_v47  ;;  %1372 = vmatpush.msra.mxu1 %v787_v49  ;;  %v868_v6 = vld [vmem:[%s2450_s29 + $0x858] sm:$0xff]  ;;  %v739_v11 = vld [vmem:[%s2450_s29 + $0x450] sm:$0xff]  ;;  %v1069_v47 = vld [vmem:[%s2450_s29 + $0xea0] sm:$0xff] }
  0xe4   : > { %1493 = vmatpush.msrb.mxu3 %v1036_v55  ;;  %1475 = vmatpush.msrb.mxu2 %v892_v57  ;;  %v1004_v8 = vld [vmem:[%s2450_s29 + $0xc98] sm:$0xff]  ;;  %v731_v15 = vld [vmem:[%s2450_s29 + $0x410] sm:$0xff]  ;;  %v925_v49 = vld [vmem:[%s2450_s29 + $0xa20] sm:$0xff] }
  0xe5   : > { %1426 = vmatpush.msrb.mxu0 %v708_v51  ;;  %1373 = vmatpush.msra.mxu1 %v779_v53  ;;  %v668_v9 = vld [vmem:[%s2450_s29 + $0x218] sm:$0xff]  ;;  %v709_v50 = vld [vmem:[%s2450_s29 + $0x360] sm:$0xff] }
  0xe6   : > { %1494 = vmatpush.msrb.mxu3 %v1028_v60  ;;  %1476 = vmatpush.msrb.mxu2 %v884_v62  ;;  %v860_v10 = vld [vmem:[%s2450_s29 + $0x818] sm:$0xff]  ;;  %v1061_v51 = vld [vmem:[%s2450_s29 + $0xe60] sm:$0xff] }
  0xe7   : > { %1427 = vmatpush.msrb.mxu0 %v700_v56  ;;  %1374 = vmatpush.msra.mxu1 %v771_v58  ;;  %v996_v12 = vld [vmem:[%s2450_s29 + $0xc58] sm:$0xff]  ;;  %v917_v53 = vld [vmem:[%s2450_s29 + $0x9e0] sm:$0xff] }
  0xe8   : > { %1495 = vmatpush.msrb.mxu3 %v1020_v0  ;;  %1477 = vmatpush.msrb.mxu2 %v876_v2  ;;  %v660_v13 = vld [vmem:[%s2450_s29 + $0x1d8] sm:$0xff]  ;;  %v701_v55 = vld [vmem:[%s2450_s29 + $0x320] sm:$0xff] }
  0xe9   : > { %1428 = vmatpush.msrb.mxu0 %v692_v61  ;;  %1375 = vmatpush.msra.mxu1 %v763_v63  ;;  %v988_v16 = vld [vmem:[%s2450_s29 + $0xc18] sm:$0xff]  ;;  %v1053_v56 = vld [vmem:[%s2450_s29 + $0xe20] sm:$0xff] }
  0xea   : > { %1496 = vmatpush.msrb.mxu3 %v1012_v4  ;;  %1478 = vmatpush.msrb.mxu2 %v868_v6  ;;  %v852_v19 = vld [vmem:[%s2450_s29 + $0x7d8] sm:$0xff]  ;;  %v909_v58 = vld [vmem:[%s2450_s29 + $0x9a0] sm:$0xff] }
  0xeb   : > { %1429 = vmatpush.msrb.mxu0 %v684_v1  ;;  %1376 = vmatpush.msra.mxu1 %v755_v3  ;;  %v652_v20 = vld [vmem:[%s2450_s29 + $0x198] sm:$0xff]  ;;  %v693_v60 = vld [vmem:[%s2450_s29 + $0x2e0] sm:$0xff] }
  0xec   : > { %1497 = vmatpush.msrb.mxu3 %v1004_v8  ;;  %1479 = vmatpush.msrb.mxu2 %v860_v10  ;;  %v844_v22 = vld [vmem:[%s2450_s29 + $0x798] sm:$0xff]  ;;  %v1045_v61 = vld [vmem:[%s2450_s29 + $0xde0] sm:$0xff] }
  0xed   : > { %1430 = vmatpush.msrb.mxu0 %v676_v5  ;;  %1377 = vmatpush.msra.mxu1 %v747_v7  ;;  %v644_v23 = vld [vmem:[%s2450_s29 + $0x158] sm:$0xff]  ;;  %v901_v63 = vld [vmem:[%s2450_s29 + $0x960] sm:$0xff] }
  0xee   : > { %1498 = vmatpush.msrb.mxu3 %v996_v12  ;;  %1544 = vmatpush.msra.mxu2 %v981_v14  ;;  %v836_v25 = vld [vmem:[%s2450_s29 + $0x758] sm:$0xff]  ;;  %v685_v0 = vld [vmem:[%s2450_s29 + $0x2a0] sm:$0xff] }
  0xef   : > { %1431 = vmatpush.msrb.mxu0 %v668_v9  ;;  %1378 = vmatpush.msra.mxu1 %v739_v11  ;;  %v636_v26 = vld [vmem:[%s2450_s29 + $0x118] sm:$0xff]  ;;  %v1037_v1 = vld [vmem:[%s2450_s29 + $0xda0] sm:$0xff] }
  0xf0   : > { %1499 = vmatpush.msrb.mxu3 %v988_v16  ;;  %1545 = vmatpush.msra.mxu2 %v973_v21  ;;  %v828_v28 = vld [vmem:[%s2450_s29 + $0x718] sm:$0xff]  ;;  %v893_v3 = vld [vmem:[%s2450_s29 + $0x920] sm:$0xff] }
  0xf1   : > { %1432 = vmatpush.msrb.mxu0 %v660_v13  ;;  %1379 = vmatpush.msra.mxu1 %v731_v15  ;;  %v628_v29 = vld [vmem:[%s2450_s29 + $0xd8] sm:$0xff]  ;;  %v677_v4 = vld [vmem:[%s2450_s29 + $0x260] sm:$0xff] }
  0xf2   : > { %1420 = vmatmul.f32.vlgmr.msra.gmra.mxu3 %v2658_v17  ;;  %1360 = vmatmul.f32.vlgmr.msra.gmra.mxu0 %v2700_v59  ;;  %v820_v32 = vld [vmem:[%s2450_s29 + $0x6d8] sm:$0xff]  ;;  %v1029_v5 = vld [vmem:[%s2450_s29 + $0xd60] sm:$0xff] }
  0xf3   : > { %1444 = vmatpush.msrb.mxu1 %v852_v19  ;;  %1433 = vmatpush.msrb.mxu0 %v652_v20  ;;  %v620_v33 = vld [vmem:[%s2450_s29 + $0x98] sm:$0xff]  ;;  %v885_v7 = vld [vmem:[%s2450_s29 + $0x8e0] sm:$0xff] }
  0xf4   : > { %1564 = vmatpush.msra.mxu3 %v1109_v24  ;;  %1380 = vmatmul.f32.vlgmr.msra.gmra.mxu1 %v2740_v18  ;;  %v812_v36 = vld [vmem:[%s2450_s29 + $0x698] sm:$0xff]  ;;  %v669_v8 = vld [vmem:[%s2450_s29 + $0x220] sm:$0xff] }
  0xf5   : > { %1445 = vmatpush.msrb.mxu1 %v844_v22  ;;  %1434 = vmatpush.msrb.mxu0 %v644_v23  ;;  %v612_v37 = vld [vmem:[%s2450_s29 + $0x58] sm:$0xff]  ;;  %v1021_v9 = vld [vmem:[%s2450_s29 + $0xd20] sm:$0xff] }
  0xf6   : > { %1546 = vmatpush.msra.mxu2 %v965_v27  ;;  %1565 = vmatpush.msra.mxu3 %v1101_v30  ;;  %v804_v40 = vld [vmem:[%s2450_s29 + $0x658] sm:$0xff]  ;;  %v877_v11 = vld [vmem:[%s2450_s29 + $0x8a0] sm:$0xff]  ;;  %v982_v27 = vld [vmem:[%s2450_s29 + $0xbe8] sm:$0xff] }
  0xf7   : > { %1446 = vmatpush.msrb.mxu1 %v836_v25  ;;  %1435 = vmatpush.msrb.mxu0 %v636_v26  ;;  %v604_v41 = vld [vmem:[%s2450_s29 + $0x18] sm:$0xff]  ;;  %v661_v12 = vld [vmem:[%s2450_s29 + $0x1e0] sm:$0xff] }
  0xf8   : > { %1547 = vmatpush.msra.mxu2 %v957_v31  ;;  %1566 = vmatpush.msra.mxu3 %v1093_v34  ;;  %v796_v44 = vld [vmem:[%s2450_s29 + $0x618] sm:$0xff]  ;;  %v1013_v13 = vld [vmem:[%s2450_s29 + $0xce0] sm:$0xff]  ;;  %v974_v31 = vld [vmem:[%s2450_s29 + $0xba8] sm:$0xff] }
  0xf9   : > { %1447 = vmatpush.msrb.mxu1 %v828_v28  ;;  %1436 = vmatpush.msrb.mxu0 %v628_v29  ;;  %v788_v48 = vld [vmem:[%s2450_s29 + $0x5d8] sm:$0xff]  ;;  %v869_v15 = vld [vmem:[%s2450_s29 + $0x860] sm:$0xff]  ;;  %v1110_v34 = vld [vmem:[%s2450_s29 + $0xfe8] sm:$0xff] }
  0xfa   : > { %1548 = vmatpush.msra.mxu2 %v949_v35  ;;  %1567 = vmatpush.msra.mxu3 %v1085_v38  ;;  %v780_v52 = vld [vmem:[%s2450_s29 + $0x598] sm:$0xff]  ;;  %v853_v16 = vld [vmem:[%s2450_s29 + $0x7e0] sm:$0xff] }
  0xfb   : > { %1448 = vmatpush.msrb.mxu1 %v820_v32  ;;  %1437 = vmatpush.msrb.mxu0 %v620_v33  ;;  %v772_v57 = vld [vmem:[%s2450_s29 + $0x558] sm:$0xff]  ;;  %v653_v19 = vld [vmem:[%s2450_s29 + $0x1a0] sm:$0xff] }
  0xfc   : > { %1549 = vmatpush.msra.mxu2 %v941_v39  ;;  %1568 = vmatpush.msra.mxu3 %v1077_v43  ;;  %v764_v62 = vld [vmem:[%s2450_s29 + $0x518] sm:$0xff]  ;;  %v1005_v20 = vld [vmem:[%s2450_s29 + $0xca0] sm:$0xff]  ;;  %v958_v43 = vld [vmem:[%s2450_s29 + $0xb28] sm:$0xff] }
  0xfd   : > { %1449 = vmatpush.msrb.mxu1 %v812_v36  ;;  %1438 = vmatpush.msrb.mxu0 %v612_v37  ;;  %v756_v2 = vld [vmem:[%s2450_s29 + $0x4d8] sm:$0xff]  ;;  %v861_v21 = vld [vmem:[%s2450_s29 + $0x820] sm:$0xff]  ;;  %v966_v37 = vld [vmem:[%s2450_s29 + $0xb68] sm:$0xff] }
  0xfe   : > { %1550 = vmatpush.msra.mxu2 %v933_v45  ;;  %1569 = vmatpush.msra.mxu3 %v1069_v47  ;;  %v748_v6 = vld [vmem:[%s2450_s29 + $0x498] sm:$0xff]  ;;  %v845_v22 = vld [vmem:[%s2450_s29 + $0x7a0] sm:$0xff]  ;;  %v1094_v45 = vld [vmem:[%s2450_s29 + $0xf68] sm:$0xff] }
  0xff   : > { %1450 = vmatpush.msrb.mxu1 %v804_v40  ;;  %1439 = vmatpush.msrb.mxu0 %v604_v41  ;;  %v740_v10 = vld [vmem:[%s2450_s29 + $0x458] sm:$0xff]  ;;  %v645_v23 = vld [vmem:[%s2450_s29 + $0x160] sm:$0xff]  ;;  %v726_v40 = vld [vmem:[%s2450_s29 + $0x3e8] sm:$0xff] }
 0x100   : > { %1551 = vmatpush.msra.mxu2 %v925_v49  ;;  %1570 = vmatpush.msra.mxu3 %v1061_v51  ;;  %v732_v14 = vld [vmem:[%s2450_s29 + $0x418] sm:$0xff]  ;;  %v997_v24 = vld [vmem:[%s2450_s29 + $0xc60] sm:$0xff]  ;;  %v1102_v41 = vld [vmem:[%s2450_s29 + $0xfa8] sm:$0xff] }
 0x101   : > { %1504 = vmatpush.msra.mxu0 %v725_v42  ;;  %1451 = vmatpush.msrb.mxu1 %v796_v44  ;;  %v837_v25 = vld [vmem:[%s2450_s29 + $0x760] sm:$0xff]  ;;  %v718_v44 = vld [vmem:[%s2450_s29 + $0x3a8] sm:$0xff] }
 0x102   : > { %1552 = vmatpush.msra.mxu2 %v917_v53  ;;  %1571 = vmatpush.msra.mxu3 %v1053_v56  ;;  %v637_v26 = vld [vmem:[%s2450_s29 + $0x120] sm:$0xff]  ;;  %v950_v47 = vld [vmem:[%s2450_s29 + $0xae8] sm:$0xff] }
 0x103   : > { %1505 = vmatpush.msra.mxu0 %v717_v46  ;;  %1452 = vmatpush.msrb.mxu1 %v788_v48  ;;  %v989_v28 = vld [vmem:[%s2450_s29 + $0xc20] sm:$0xff]  ;;  %v710_v48 = vld [vmem:[%s2450_s29 + $0x368] sm:$0xff] }
 0x104   : > { %1553 = vmatpush.msra.mxu2 %v909_v58  ;;  %1572 = vmatpush.msra.mxu3 %v1045_v61  ;;  %v829_v29 = vld [vmem:[%s2450_s29 + $0x720] sm:$0xff]  ;;  %v1086_v49 = vld [vmem:[%s2450_s29 + $0xf28] sm:$0xff] }
 0x105   : > { %1506 = vmatpush.msra.mxu0 %v709_v50  ;;  %1453 = vmatpush.msrb.mxu1 %v780_v52  ;;  %v629_v30 = vld [vmem:[%s2450_s29 + $0xe0] sm:$0xff]  ;;  %v942_v51 = vld [vmem:[%s2450_s29 + $0xaa8] sm:$0xff] }
 0x106   : > { %1554 = vmatpush.msra.mxu2 %v901_v63  ;;  %1573 = vmatpush.msra.mxu3 %v1037_v1  ;;  %v821_v32 = vld [vmem:[%s2450_s29 + $0x6e0] sm:$0xff]  ;;  %v702_v52 = vld [vmem:[%s2450_s29 + $0x328] sm:$0xff] }
 0x107   : > { %1507 = vmatpush.msra.mxu0 %v701_v55  ;;  %1454 = vmatpush.msrb.mxu1 %v772_v57  ;;  %v621_v33 = vld [vmem:[%s2450_s29 + $0xa0] sm:$0xff]  ;;  %v1078_v53 = vld [vmem:[%s2450_s29 + $0xee8] sm:$0xff] }
 0x108   : > { %1555 = vmatpush.msra.mxu2 %v893_v3  ;;  %1574 = vmatpush.msra.mxu3 %v1029_v5  ;;  %v813_v35 = vld [vmem:[%s2450_s29 + $0x6a0] sm:$0xff]  ;;  %v934_v56 = vld [vmem:[%s2450_s29 + $0xa68] sm:$0xff] }
 0x109   : > { %1508 = vmatpush.msra.mxu0 %v693_v60  ;;  %1455 = vmatpush.msrb.mxu1 %v764_v62  ;;  %v613_v36 = vld [vmem:[%s2450_s29 + $0x60] sm:$0xff]  ;;  %v694_v57 = vld [vmem:[%s2450_s29 + $0x2e8] sm:$0xff] }
 0x10a   : > { %1556 = vmatpush.msra.mxu2 %v885_v7  ;;  %1575 = vmatpush.msra.mxu3 %v1021_v9  ;;  %v805_v38 = vld [vmem:[%s2450_s29 + $0x660] sm:$0xff]  ;;  %v1070_v58 = vld [vmem:[%s2450_s29 + $0xea8] sm:$0xff] }
 0x10b   : > { %1509 = vmatpush.msra.mxu0 %v685_v0  ;;  %1456 = vmatpush.msrb.mxu1 %v756_v2  ;;  %v605_v39 = vld [vmem:[%s2450_s29 + $0x20] sm:$0xff]  ;;  %v926_v61 = vld [vmem:[%s2450_s29 + $0xa28] sm:$0xff] }
 0x10c   : > { %1557 = vmatpush.msra.mxu2 %v877_v11  ;;  %1576 = vmatpush.msra.mxu3 %v1013_v13  ;;  %v797_v42 = vld [vmem:[%s2450_s29 + $0x620] sm:$0xff]  ;;  %v686_v62 = vld [vmem:[%s2450_s29 + $0x2a8] sm:$0xff] }
 0x10d   : > { %1510 = vmatpush.msra.mxu0 %v677_v4  ;;  %1457 = vmatpush.msrb.mxu1 %v748_v6  ;;  %v789_v46 = vld [vmem:[%s2450_s29 + $0x5e0] sm:$0xff]  ;;  %v1062_v63 = vld [vmem:[%s2450_s29 + $0xe68] sm:$0xff] }
 0x10e   : > { %1558 = vmatpush.msra.mxu2 %v869_v15  ;;  %1577 = vmatpush.msra.mxu3 %v1005_v20  ;;  %v781_v50 = vld [vmem:[%s2450_s29 + $0x5a0] sm:$0xff]  ;;  %v918_v1 = vld [vmem:[%s2450_s29 + $0x9e8] sm:$0xff] }
 0x10f   : > { %1511 = vmatpush.msra.mxu0 %v669_v8  ;;  %1458 = vmatpush.msrb.mxu1 %v740_v10  ;;  %v773_v55 = vld [vmem:[%s2450_s29 + $0x560] sm:$0xff]  ;;  %v678_v2 = vld [vmem:[%s2450_s29 + $0x268] sm:$0xff] }
 0x110   : > { %1559 = vmatpush.msra.mxu2 %v861_v21  ;;  %1578 = vmatpush.msra.mxu3 %v997_v24  ;;  %v765_v60 = vld [vmem:[%s2450_s29 + $0x520] sm:$0xff]  ;;  %v1054_v3 = vld [vmem:[%s2450_s29 + $0xe28] sm:$0xff] }
 0x111   : > { %1512 = vmatpush.msra.mxu0 %v661_v12  ;;  %1459 = vmatpush.msrb.mxu1 %v732_v14  ;;  %v757_v0 = vld [vmem:[%s2450_s29 + $0x4e0] sm:$0xff]  ;;  %v910_v5 = vld [vmem:[%s2450_s29 + $0x9a8] sm:$0xff] }
 0x112   : > { %1480 = vmatmul.f32.vlgmr.msrb.gmra.mxu2 %v2629_v54  ;;  %1579 = vmatpush.msra.mxu3 %v989_v28  ;;  %v749_v4 = vld [vmem:[%s2450_s29 + $0x4a0] sm:$0xff]  ;;  %v670_v6 = vld [vmem:[%s2450_s29 + $0x228] sm:$0xff] }
 0x113   : > { %1524 = vmatpush.msra.mxu1 %v853_v16  ;;  %1513 = vmatpush.msra.mxu0 %v653_v19  ;;  %v1046_v7 = vld [vmem:[%s2450_s29 + $0xde8] sm:$0xff]  ;;  %v741_v8 = vld [vmem:[%s2450_s29 + $0x460] sm:$0xff] }
 0x114   : > { %1624 = vmatpush.msrb.mxu2 %v982_v27  ;;  %1500 = vmatmul.f32.vlgmr.msrb.gmra.mxu3 %v2658_v17  ;;  %v902_v9 = vld [vmem:[%s2450_s29 + $0x968] sm:$0xff]  ;;  %v733_v12 = vld [vmem:[%s2450_s29 + $0x420] sm:$0xff] }
 0x115   : > { %1525 = vmatpush.msra.mxu1 %v845_v22  ;;  %1514 = vmatpush.msra.mxu0 %v645_v23  ;;  %v662_v10 = vld [vmem:[%s2450_s29 + $0x1e8] sm:$0xff] }
 0x116   : > { %1625 = vmatpush.msrb.mxu2 %v974_v31  ;;  %1644 = vmatpush.msrb.mxu3 %v1110_v34  ;;  %v1038_v11 = vld [vmem:[%s2450_s29 + $0xda8] sm:$0xff] }
 0x117   : > { %1526 = vmatpush.msra.mxu1 %v837_v25  ;;  %1515 = vmatpush.msra.mxu0 %v637_v26  ;;  %v894_v13 = vld [vmem:[%s2450_s29 + $0x928] sm:$0xff] }
 0x118   : > { %1440 = vmatmul.f32.vlgmr.msrb.gmra.mxu0 %v2700_v59  ;;  %1460 = vmatmul.f32.vlgmr.msrb.gmra.mxu1 %v2740_v18  ;;  %v854_v14 = vld [vmem:[%s2450_s29 + $0x7e8] sm:$0xff] }
 0x119   : > { %1527 = vmatpush.msra.mxu1 %v829_v29  ;;  %1516 = vmatpush.msra.mxu0 %v629_v30  ;;  %v654_v15 = vld [vmem:[%s2450_s29 + $0x1a8] sm:$0xff] }
 0x11a   : > { %1626 = vmatpush.msrb.mxu2 %v966_v37  ;;  %1645 = vmatpush.msrb.mxu3 %v1102_v41  ;;  %v1030_v16 = vld [vmem:[%s2450_s29 + $0xd68] sm:$0xff]  ;;  %v1111_v41 = vld [vmem:[%s2450_s29 + $0xff0] sm:$0xff] }
 0x11b   : > { %1528 = vmatpush.msra.mxu1 %v821_v32  ;;  %1517 = vmatpush.msra.mxu0 %v621_v33  ;;  %v886_v19 = vld [vmem:[%s2450_s29 + $0x8e8] sm:$0xff] }
 0x11c   : > { %1627 = vmatpush.msrb.mxu2 %v958_v43  ;;  %1646 = vmatpush.msrb.mxu3 %v1094_v45  ;;  %v846_v20 = vld [vmem:[%s2450_s29 + $0x7a8] sm:$0xff]  ;;  %v727_v45 = vld [vmem:[%s2450_s29 + $0x3f0] sm:$0xff] }
 0x11d   : > { %1529 = vmatpush.msra.mxu1 %v813_v35  ;;  %1518 = vmatpush.msra.mxu0 %v613_v36  ;;  %v646_v21 = vld [vmem:[%s2450_s29 + $0x168] sm:$0xff]  ;;  %v983_v36 = vld [vmem:[%s2450_s29 + $0xbf0] sm:$0xff] }
 0x11e   : > { %1628 = vmatpush.msrb.mxu2 %v950_v47  ;;  %1647 = vmatpush.msrb.mxu3 %v1086_v49  ;;  %v1022_v22 = vld [vmem:[%s2450_s29 + $0xd28] sm:$0xff]  ;;  %v1103_v47 = vld [vmem:[%s2450_s29 + $0xfb0] sm:$0xff] }
 0x11f   : > { %1530 = vmatpush.msra.mxu1 %v805_v38  ;;  %1519 = vmatpush.msra.mxu0 %v605_v39  ;;  %v878_v23 = vld [vmem:[%s2450_s29 + $0x8a8] sm:$0xff]  ;;  %v719_v49 = vld [vmem:[%s2450_s29 + $0x3b0] sm:$0xff] }
 0x120   : > { %1629 = vmatpush.msrb.mxu2 %v942_v51  ;;  %1648 = vmatpush.msrb.mxu3 %v1078_v53  ;;  %v838_v24 = vld [vmem:[%s2450_s29 + $0x768] sm:$0xff]  ;;  %v1095_v51 = vld [vmem:[%s2450_s29 + $0xf70] sm:$0xff] }
 0x121   : > { %1584 = vmatpush.msrb.mxu0 %v726_v40  ;;  %1531 = vmatpush.msra.mxu1 %v797_v42  ;;  %v638_v25 = vld [vmem:[%s2450_s29 + $0x128] sm:$0xff]  ;;  %v975_v40 = vld [vmem:[%s2450_s29 + $0xbb0] sm:$0xff] }
 0x122   : > { %1630 = vmatpush.msrb.mxu2 %v934_v56  ;;  %1649 = vmatpush.msrb.mxu3 %v1070_v58  ;;  %v1014_v26 = vld [vmem:[%s2450_s29 + $0xce8] sm:$0xff]  ;;  %v711_v53 = vld [vmem:[%s2450_s29 + $0x370] sm:$0xff] }
 0x123   : > { %1585 = vmatpush.msrb.mxu0 %v718_v44  ;;  %1532 = vmatpush.msra.mxu1 %v789_v46  ;;  %v870_v27 = vld [vmem:[%s2450_s29 + $0x868] sm:$0xff]  ;;  %v967_v46 = vld [vmem:[%s2450_s29 + $0xb70] sm:$0xff] }
 0x124   : > { %1631 = vmatpush.msrb.mxu2 %v926_v61  ;;  %1650 = vmatpush.msrb.mxu3 %v1062_v63  ;;  %v830_v28 = vld [vmem:[%s2450_s29 + $0x728] sm:$0xff]  ;;  %v1087_v56 = vld [vmem:[%s2450_s29 + $0xf30] sm:$0xff] }
 0x125   : > { %1586 = vmatpush.msrb.mxu0 %v710_v48  ;;  %1533 = vmatpush.msra.mxu1 %v781_v50  ;;  %v630_v29 = vld [vmem:[%s2450_s29 + $0xe8] sm:$0xff]  ;;  %v959_v50 = vld [vmem:[%s2450_s29 + $0xb30] sm:$0xff] }
 0x126   : > { %1632 = vmatpush.msrb.mxu2 %v918_v1  ;;  %1651 = vmatpush.msrb.mxu3 %v1054_v3  ;;  %v1006_v30 = vld [vmem:[%s2450_s29 + $0xca8] sm:$0xff]  ;;  %v703_v58 = vld [vmem:[%s2450_s29 + $0x330] sm:$0xff] }
 0x127   : > { %1587 = vmatpush.msrb.mxu0 %v702_v52  ;;  %1534 = vmatpush.msra.mxu1 %v773_v55  ;;  %v862_v31 = vld [vmem:[%s2450_s29 + $0x828] sm:$0xff]  ;;  %v951_v55 = vld [vmem:[%s2450_s29 + $0xaf0] sm:$0xff] }
 0x128   : > { %1633 = vmatpush.msrb.mxu2 %v910_v5  ;;  %1652 = vmatpush.msrb.mxu3 %v1046_v7  ;;  %v822_v32 = vld [vmem:[%s2450_s29 + $0x6e8] sm:$0xff]  ;;  %v1079_v61 = vld [vmem:[%s2450_s29 + $0xef0] sm:$0xff] }
 0x129   : > { %1588 = vmatpush.msrb.mxu0 %v694_v57  ;;  %1535 = vmatpush.msra.mxu1 %v765_v60  ;;  %v622_v33 = vld [vmem:[%s2450_s29 + $0xa8] sm:$0xff]  ;;  %v943_v60 = vld [vmem:[%s2450_s29 + $0xab0] sm:$0xff] }
 0x12a   : > { %1634 = vmatpush.msrb.mxu2 %v902_v9  ;;  %1653 = vmatpush.msrb.mxu3 %v1038_v11  ;;  %v998_v34 = vld [vmem:[%s2450_s29 + $0xc68] sm:$0xff]  ;;  %v695_v63 = vld [vmem:[%s2450_s29 + $0x2f0] sm:$0xff] }
 0x12b   : > { %1589 = vmatpush.msrb.mxu0 %v686_v62  ;;  %1536 = vmatpush.msra.mxu1 %v757_v0  ;;  %v814_v35 = vld [vmem:[%s2450_s29 + $0x6a8] sm:$0xff]  ;;  %v935_v0 = vld [vmem:[%s2450_s29 + $0xa70] sm:$0xff] }
 0x12c   : > { %1635 = vmatpush.msrb.mxu2 %v894_v13  ;;  %1654 = vmatpush.msrb.mxu3 %v1030_v16  ;;  %v614_v37 = vld [vmem:[%s2450_s29 + $0x68] sm:$0xff]  ;;  %v1071_v1 = vld [vmem:[%s2450_s29 + $0xeb0] sm:$0xff] }
 0x12d   : > { %1590 = vmatpush.msrb.mxu0 %v678_v2  ;;  %1537 = vmatpush.msra.mxu1 %v749_v4  ;;  %v990_v38 = vld [vmem:[%s2450_s29 + $0xc28] sm:$0xff]  ;;  %v687_v3 = vld [vmem:[%s2450_s29 + $0x2b0] sm:$0xff] }
 0x12e   : > { %1636 = vmatpush.msrb.mxu2 %v886_v19  ;;  %1655 = vmatpush.msrb.mxu3 %v1022_v22  ;;  %v806_v39 = vld [vmem:[%s2450_s29 + $0x668] sm:$0xff]  ;;  %v927_v4 = vld [vmem:[%s2450_s29 + $0xa30] sm:$0xff]  ;;  %v1241_v22 = vpop.f32.mrf.mxu2 }
 0x12f   : > { %1591 = vmatpush.msrb.mxu0 %v670_v6  ;;  %1538 = vmatpush.msra.mxu1 %v741_v8  ;;  %v798_v42 = vld [vmem:[%s2450_s29 + $0x628] sm:$0xff]  ;;  %v1063_v5 = vld [vmem:[%s2450_s29 + $0xe70] sm:$0xff] }
 0x130   : > { %1637 = vmatpush.msrb.mxu2 %v878_v23  ;;  %1656 = vmatpush.msrb.mxu3 %v1014_v26  ;;  %v606_v43 = vld [vmem:[%s2450_s29 + $0x28] sm:$0xff]  ;;  %v679_v7 = vld [vmem:[%s2450_s29 + $0x270] sm:$0xff] }
 0x131   : > { %1592 = vmatpush.msrb.mxu0 %v662_v10  ;;  %1539 = vmatpush.msra.mxu1 %v733_v12  ;;  %v790_v44 = vld [vmem:[%s2450_s29 + $0x5e8] sm:$0xff]  ;;  %v919_v8 = vld [vmem:[%s2450_s29 + $0x9f0] sm:$0xff] }
 0x132   : > { %1638 = vmatpush.msrb.mxu2 %v870_v27  ;;  %1657 = vmatpush.msrb.mxu3 %v1006_v30  ;;  %v782_v48 = vld [vmem:[%s2450_s29 + $0x5a8] sm:$0xff]  ;;  %v1055_v9 = vld [vmem:[%s2450_s29 + $0xe30] sm:$0xff] }
 0x133   : > { %1604 = vmatpush.msrb.mxu1 %v854_v14  ;;  %1593 = vmatpush.msrb.mxu0 %v654_v15  ;;  %v774_v52 = vld [vmem:[%s2450_s29 + $0x568] sm:$0xff]  ;;  %v671_v11 = vld [vmem:[%s2450_s29 + $0x230] sm:$0xff] }
 0x134   : > { %1639 = vmatpush.msrb.mxu2 %v862_v31  ;;  %1658 = vmatpush.msrb.mxu3 %v998_v34  ;;  %v766_v57 = vld [vmem:[%s2450_s29 + $0x528] sm:$0xff]  ;;  %v855_v12 = vld [vmem:[%s2450_s29 + $0x7f0] sm:$0xff] }
 0x135   : > { %1605 = vmatpush.msrb.mxu1 %v846_v20  ;;  %1594 = vmatpush.msrb.mxu0 %v646_v21  ;;  %v758_v62 = vld [vmem:[%s2450_s29 + $0x4e8] sm:$0xff]  ;;  %v911_v13 = vld [vmem:[%s2450_s29 + $0x9b0] sm:$0xff] }
 0x136   : > { %1560 = vmatmul.f32.vlgmr.msra.gmra.mxu2 %v2629_v54  ;;  %1659 = vmatpush.msrb.mxu3 %v990_v38  ;;  %v750_v2 = vld [vmem:[%s2450_s29 + $0x4a8] sm:$0xff]  ;;  %v1047_v15 = vld [vmem:[%s2450_s29 + $0xdf0] sm:$0xff] }
 0x137   : > { %1606 = vmatpush.msrb.mxu1 %v838_v24  ;;  %1595 = vmatpush.msrb.mxu0 %v638_v25  ;;  %v742_v6 = vld [vmem:[%s2450_s29 + $0x468] sm:$0xff]  ;;  %v663_v16 = vld [vmem:[%s2450_s29 + $0x1f0] sm:$0xff] }
 0x138   : > { %1704 = vmatpush.msra.mxu2 %v983_v36  ;;  %1580 = vmatmul.f32.vlgmr.msra.gmra.mxu3 %v2658_v17  ;;  %v734_v10 = vld [vmem:[%s2450_s29 + $0x428] sm:$0xff]  ;;  %v847_v19 = vld [vmem:[%s2450_s29 + $0x7b0] sm:$0xff] }
 0x139   : > { %1607 = vmatpush.msrb.mxu1 %v830_v28  ;;  %1596 = vmatpush.msrb.mxu0 %v630_v29  ;;  %v903_v20 = vld [vmem:[%s2450_s29 + $0x970] sm:$0xff]  ;;  %v1261_v28 = vpop.f32.mrf.mxu3 }
 0x13a   : > { %1705 = vmatpush.msra.mxu2 %v975_v40  ;;  %1724 = vmatpush.msra.mxu3 %v1111_v41  ;;  %v1039_v23 = vld [vmem:[%s2450_s29 + $0xdb0] sm:$0xff] }
 0x13b   : > { %1608 = vmatpush.msrb.mxu1 %v822_v32  ;;  %1597 = vmatpush.msrb.mxu0 %v622_v33  ;;  %v655_v24 = vld [vmem:[%s2450_s29 + $0x1b0] sm:$0xff] }
 0x13c   : > { %1520 = vmatmul.f32.vlgmr.msra.gmra.mxu0 %v2700_v59  ;;  %1540 = vmatmul.f32.vlgmr.msra.gmra.mxu1 %v2740_v18  ;;  %v839_v26 = vld [vmem:[%s2450_s29 + $0x770] sm:$0xff] }
 0x13d   : > { %1609 = vmatpush.msrb.mxu1 %v814_v35  ;;  %1598 = vmatpush.msrb.mxu0 %v614_v37  ;;  %v1201_v14 = vpop.f32.mrf.mxu0  ;;  %v895_v27 = vld [vmem:[%s2450_s29 + $0x930] sm:$0xff] }
 0x13e   : > { %1706 = vmatpush.msra.mxu2 %v967_v46  ;;  %1725 = vmatpush.msra.mxu3 %v1103_v47  ;;  %v1031_v29 = vld [vmem:[%s2450_s29 + $0xd70] sm:$0xff] }
 0x13f   : > { %1610 = vmatpush.msrb.mxu1 %v806_v39  ;;  %1599 = vmatpush.msrb.mxu0 %v606_v43  ;;  %v647_v30 = vld [vmem:[%s2450_s29 + $0x170] sm:$0xff] }
 0x140   : > { %1707 = vmatpush.msra.mxu2 %v959_v50  ;;  %1726 = vmatpush.msra.mxu3 %v1095_v51  ;;  %v831_v32 = vld [vmem:[%s2450_s29 + $0x730] sm:$0xff] }
 0x141   : > { %1611 = vmatpush.msrb.mxu1 %v798_v42  ;;  %1664 = vmatpush.msra.mxu0 %v727_v45  ;;  %v887_v33 = vld [vmem:[%s2450_s29 + $0x8f0] sm:$0xff] }
 0x142   : > { %1708 = vmatpush.msra.mxu2 %v951_v55  ;;  %1727 = vmatpush.msra.mxu3 %v1087_v56  ;;  %v593_v34 = vld [vmem:[#allocation2 + $0x30] sm:$0xff]  ;;  %v1341_v55 = vpop.f32.mrf.mxu3 }
 0x143   : > { %1612 = vmatpush.msrb.mxu1 %v790_v44  ;;  %1665 = vmatpush.msra.mxu0 %v719_v49  ;;  %v1023_v35 = vld [vmem:[%s2450_s29 + $0xd30] sm:$0xff]  ;;  %v1321_v49 = vpop.f32.mrf.mxu2 }
 0x144   : > { %1709 = vmatpush.msra.mxu2 %v943_v60  ;;  %1728 = vmatpush.msra.mxu3 %v1079_v61  ;;  %v639_v36 = vld [vmem:[%s2450_s29 + $0x130] sm:$0xff] }
 0x145   : > { %1613 = vmatpush.msrb.mxu1 %v782_v48  ;;  %1666 = vmatpush.msra.mxu0 %v711_v53  ;;  %v823_v38 = vld [vmem:[%s2450_s29 + $0x6f0] sm:$0xff]  ;;  %v1281_v42 = vpop.f32.mrf.mxu0 }
 0x146   : > { %1710 = vmatpush.msra.mxu2 %v935_v0  ;;  %1729 = vmatpush.msra.mxu3 %v1071_v1  ;;  %v879_v39 = vld [vmem:[%s2450_s29 + $0x8b0] sm:$0xff]  ;;  %v976_v1 = vld [vmem:[%s2450_s29 + $0xbb8] sm:$0xff] }
 0x147   : > { %1614 = vmatpush.msrb.mxu1 %v774_v52  ;;  %1667 = vmatpush.msra.mxu0 %v703_v58  ;;  %v1015_v40 = vld [vmem:[%s2450_s29 + $0xcf0] sm:$0xff] }
 0x148   : > { %1711 = vmatpush.msra.mxu2 %v927_v4  ;;  %1730 = vmatpush.msra.mxu3 %v1063_v5  ;;  %v631_v41 = vld [vmem:[%s2450_s29 + $0xf0] sm:$0xff] }
 0x149   : > { %1615 = vmatpush.msrb.mxu1 %v766_v57  ;;  %1668 = vmatpush.msra.mxu0 %v695_v63  ;;  %v815_v44 = vld [vmem:[%s2450_s29 + $0x6b0] sm:$0xff]  ;;  %v984_v57 = vld [vmem:[%s2450_s29 + $0xbf8] sm:$0xff] }
 0x14a   : > { %1712 = vmatpush.msra.mxu2 %v919_v8  ;;  %1731 = vmatpush.msra.mxu3 %v1055_v9  ;;  %v871_v45 = vld [vmem:[%s2450_s29 + $0x870] sm:$0xff]  ;;  %v968_v8 = vld [vmem:[%s2450_s29 + $0xb78] sm:$0xff] }
 0x14b   : > { %1616 = vmatpush.msrb.mxu1 %v758_v62  ;;  %1669 = vmatpush.msra.mxu0 %v687_v3  ;;  %v1007_v46 = vld [vmem:[%s2450_s29 + $0xcb0] sm:$0xff]  ;;  %v594_v62 = vld [vmem:[#allocation2] sm:$0xff]  ;;  %v1104_v9 = vld [vmem:[%s2450_s29 + $0xfb8] sm:$0xff] }
 0x14c   : > { %1713 = vmatpush.msra.mxu2 %v911_v13  ;;  %1732 = vmatpush.msra.mxu3 %v1047_v15  ;;  %v623_v47 = vld [vmem:[%s2450_s29 + $0xb0] sm:$0xff]  ;;  %v1096_v13 = vld [vmem:[%s2450_s29 + $0xf78] sm:$0xff] }
 0x14d   : > { %1617 = vmatpush.msrb.mxu1 %v750_v2  ;;  %1670 = vmatpush.msra.mxu0 %v679_v7  ;;  %v807_v50 = vld [vmem:[%s2450_s29 + $0x670] sm:$0xff]  ;;  %v1112_v2 = vld [vmem:[%s2450_s29 + $0xff8] sm:$0xff] }
 0x14e   : > { %1714 = vmatpush.msra.mxu2 %v903_v20  ;;  %1733 = vmatpush.msra.mxu3 %v1039_v23  ;;  %v863_v51 = vld [vmem:[%s2450_s29 + $0x830] sm:$0xff]  ;;  %v728_v7 = vld [vmem:[%s2450_s29 + $0x3f8] sm:$0xff] }
 0x14f   : > { %1618 = vmatpush.msrb.mxu1 %v742_v6  ;;  %1671 = vmatpush.msra.mxu0 %v671_v11  ;;  %v1221_v21 = vpop.f32.mrf.mxu1  ;;  %v999_v53 = vld [vmem:[%s2450_s29 + $0xc70] sm:$0xff]  ;;  %v720_v11 = vld [vmem:[%s2450_s29 + $0x3b8] sm:$0xff] }
 0x150   : > { %v1222_v25 = vadd.f32 %v1221_v21, %v1201_v14  ;;  %1715 = vmatpush.msra.mxu2 %v895_v27  ;;  %1734 = vmatpush.msra.mxu3 %v1031_v29  ;;  %v799_v56 = vld [vmem:[%s2450_s29 + $0x630] sm:$0xff]  ;;  %v712_v15 = vld [vmem:[%s2450_s29 + $0x378] sm:$0xff] }
 0x151   : > { %1619 = vmatpush.msrb.mxu1 %v734_v10  ;;  %1672 = vmatpush.msra.mxu0 %v663_v16  ;;  %v615_v60 = vld [vmem:[%s2450_s29 + $0x70] sm:$0xff]  ;;  %v952_v16 = vld [vmem:[%s2450_s29 + $0xaf8] sm:$0xff] }
 0x152   : > { %v1242_v31 = vadd.f32 %v1241_v22, %v1222_v25  ;;  %1716 = vmatpush.msra.mxu2 %v887_v33  ;;  %1735 = vmatpush.msra.mxu3 %v1023_v35  ;;  %v991_v61 = vld [vmem:[%s2450_s29 + $0xc30] sm:$0xff]  ;;  %v704_v21 = vld [vmem:[%s2450_s29 + $0x338] sm:$0xff] }
 0x153   : > { %1684 = vmatpush.msra.mxu1 %v855_v12  ;;  %1673 = vmatpush.msra.mxu0 %v655_v24  ;;  %v791_v63 = vld [vmem:[%s2450_s29 + $0x5f0] sm:$0xff]  ;;  %v960_v12 = vld [vmem:[%s2450_s29 + $0xb38] sm:$0xff] }
 0x154   : > { %v1262_v37 = vadd.f32 %v1261_v28, %v1242_v31  ;;  %1717 = vmatpush.msra.mxu2 %v879_v39  ;;  %1736 = vmatpush.msra.mxu3 %v1015_v40  ;;  %v783_v3 = vld [vmem:[%s2450_s29 + $0x5b0] sm:$0xff]  ;;  %v944_v22 = vld [vmem:[%s2450_s29 + $0xab8] sm:$0xff] }
 0x155   : > { %1685 = vmatpush.msra.mxu1 %v847_v19  ;;  %1674 = vmatpush.msra.mxu0 %v647_v30  ;;  %v607_v4 = vld [vmem:[%s2450_s29 + $0x30] sm:$0xff]  ;;  %v1088_v19 = vld [vmem:[%s2450_s29 + $0xf38] sm:$0xff] }
 0x156   : > { %v1824_v43 = vadd.f32 %v1262_v37, %v593_v34  ;;  %1718 = vmatpush.msra.mxu2 %v871_v45  ;;  %1737 = vmatpush.msra.mxu3 %v1007_v46  ;;  %v775_v6 = vld [vmem:[%s2450_s29 + $0x570] sm:$0xff]  ;;  %v1080_v23 = vld [vmem:[%s2450_s29 + $0xef8] sm:$0xff] }
 0x157   : > { %1686 = vmatpush.msra.mxu1 %v839_v26  ;;  %1675 = vmatpush.msra.mxu0 %v639_v36  ;;  %v1301_v48 = vpop.f32.mrf.mxu1  ;;  %v767_v10 = vld [vmem:[%s2450_s29 + $0x530] sm:$0xff]  ;;  %v696_v25 = vld [vmem:[%s2450_s29 + $0x2f8] sm:$0xff] }
 0x158   : > { %1832 = vst [vmem:[#allocation2 + $0x30] sm:$0xff] %v1824_v43  ;;  %v1302_v52 = vadd.f32 %v1301_v48, %v1281_v42  ;;  %1719 = vmatpush.msra.mxu2 %v863_v51  ;;  %1738 = vmatpush.msra.mxu3 %v999_v53  ;;  %v759_v14 = vld [vmem:[%s2450_s29 + $0x4f0] sm:$0xff]  ;;  %v936_v26 = vld [vmem:[%s2450_s29 + $0xa78] sm:$0xff]  ;;  %v1401_v51 = vpop.f32.mrf.mxu2 }
 0x159   : > { %1687 = vmatpush.msra.mxu1 %v831_v32  ;;  %1676 = vmatpush.msra.mxu0 %v631_v41  ;;  %v751_v20 = vld [vmem:[%s2450_s29 + $0x4b0] sm:$0xff]  ;;  %v1072_v27 = vld [vmem:[%s2450_s29 + $0xeb8] sm:$0xff] }
 0x15a   : > { %v1322_v58 = vadd.f32 %v1321_v49, %v1302_v52  ;;  %1640 = vmatmul.f32.vlgmr.msrb.gmra.mxu2 %v2629_v54  ;;  %1739 = vmatpush.msra.mxu3 %v991_v61  ;;  %v743_v24 = vld [vmem:[%s2450_s29 + $0x470] sm:$0xff]  ;;  %v688_v29 = vld [vmem:[%s2450_s29 + $0x2b8] sm:$0xff] }
 0x15b   : > { %1688 = vmatpush.msra.mxu1 %v823_v38  ;;  %1677 = vmatpush.msra.mxu0 %v623_v47  ;;  %v735_v28 = vld [vmem:[%s2450_s29 + $0x430] sm:$0xff]  ;;  %v856_v30 = vld [vmem:[%s2450_s29 + $0x7f8] sm:$0xff] }
 0x15c   : > { %v1342_v0 = vadd.f32 %v1341_v55, %v1322_v58  ;;  %1784 = vmatpush.msrb.mxu2 %v984_v57  ;;  %1660 = vmatmul.f32.vlgmr.msrb.gmra.mxu3 %v2658_v17  ;;  %v928_v31 = vld [vmem:[%s2450_s29 + $0xa38] sm:$0xff] }
 0x15d   : > { %1689 = vmatpush.msra.mxu1 %v815_v44  ;;  %1678 = vmatpush.msra.mxu0 %v615_v60  ;;  %v1064_v32 = vld [vmem:[%s2450_s29 + $0xe78] sm:$0xff] }
 0x15e   : > { %v1825_v5 = vadd.f32 %v1342_v0, %v594_v62  ;;  %1785 = vmatpush.msrb.mxu2 %v976_v1  ;;  %1804 = vmatpush.msrb.mxu3 %v1112_v2  ;;  %v680_v33 = vld [vmem:[%s2450_s29 + $0x278] sm:$0xff] }
 0x15f   : > { %1690 = vmatpush.msra.mxu1 %v807_v50  ;;  %1679 = vmatpush.msra.mxu0 %v607_v4  ;;  %v848_v34 = vld [vmem:[%s2450_s29 + $0x7b8] sm:$0xff] }
 0x160   : > { %1833 = vst [vmem:[#allocation2] sm:$0xff] %v1825_v5  ;;  %1600 = vmatmul.f32.vlgmr.msrb.gmra.mxu0 %v2700_v59  ;;  %1620 = vmatmul.f32.vlgmr.msrb.gmra.mxu1 %v2740_v18  ;;  %v920_v35 = vld [vmem:[%s2450_s29 + $0x9f8] sm:$0xff] }
 0x161   : > { %1691 = vmatpush.msra.mxu1 %v799_v56  ;;  %1744 = vmatpush.msrb.mxu0 %v728_v7  ;;  %v1056_v36 = vld [vmem:[%s2450_s29 + $0xe38] sm:$0xff] }
 0x162   : > { %1786 = vmatpush.msrb.mxu2 %v968_v8  ;;  %1805 = vmatpush.msrb.mxu3 %v1104_v9  ;;  %v672_v37 = vld [vmem:[%s2450_s29 + $0x238] sm:$0xff] }
 0x163   : > { %1692 = vmatpush.msra.mxu1 %v791_v63  ;;  %1745 = vmatpush.msrb.mxu0 %v720_v11  ;;  %v840_v38 = vld [vmem:[%s2450_s29 + $0x778] sm:$0xff] }
 0x164   : > { %1787 = vmatpush.msrb.mxu2 %v960_v12  ;;  %1806 = vmatpush.msrb.mxu3 %v1096_v13  ;;  %v912_v39 = vld [vmem:[%s2450_s29 + $0x9b8] sm:$0xff] }
 0x165   : > { %1693 = vmatpush.msra.mxu1 %v783_v3  ;;  %1746 = vmatpush.msrb.mxu0 %v712_v15  ;;  %v1048_v40 = vld [vmem:[%s2450_s29 + $0xdf8] sm:$0xff] }
 0x166   : > { %1788 = vmatpush.msrb.mxu2 %v952_v16  ;;  %1807 = vmatpush.msrb.mxu3 %v1088_v19  ;;  %v664_v41 = vld [vmem:[%s2450_s29 + $0x1f8] sm:$0xff] }
 0x167   : > { %1694 = vmatpush.msra.mxu1 %v775_v6  ;;  %1747 = vmatpush.msrb.mxu0 %v704_v21  ;;  %v832_v42 = vld [vmem:[%s2450_s29 + $0x738] sm:$0xff] }
 0x168   : > { %1789 = vmatpush.msrb.mxu2 %v944_v22  ;;  %1808 = vmatpush.msrb.mxu3 %v1080_v23  ;;  %v904_v43 = vld [vmem:[%s2450_s29 + $0x978] sm:$0xff] }
 0x169   : > { %1695 = vmatpush.msra.mxu1 %v767_v10  ;;  %1748 = vmatpush.msrb.mxu0 %v696_v25  ;;  %v1040_v44 = vld [vmem:[%s2450_s29 + $0xdb8] sm:$0xff] }
 0x16a   : > { %1790 = vmatpush.msrb.mxu2 %v936_v26  ;;  %1809 = vmatpush.msrb.mxu3 %v1072_v27  ;;  %v656_v45 = vld [vmem:[%s2450_s29 + $0x1b8] sm:$0xff] }
 0x16b   : > { %1696 = vmatpush.msra.mxu1 %v759_v14  ;;  %1749 = vmatpush.msrb.mxu0 %v688_v29  ;;  %v824_v47 = vld [vmem:[%s2450_s29 + $0x6f8] sm:$0xff]  ;;  %v596_v29 = vld [vmem:[#allocation2 + $0x10] sm:$0xff] }
 0x16c   : > { %1791 = vmatpush.msrb.mxu2 %v928_v31  ;;  %1810 = vmatpush.msrb.mxu3 %v1064_v32  ;;  %v896_v48 = vld [vmem:[%s2450_s29 + $0x938] sm:$0xff] }
 0x16d   : > { %1697 = vmatpush.msra.mxu1 %v751_v20  ;;  %1750 = vmatpush.msrb.mxu0 %v680_v33  ;;  %v1032_v49 = vld [vmem:[%s2450_s29 + $0xd78] sm:$0xff] }
 0x16e   : > { %1792 = vmatpush.msrb.mxu2 %v920_v35  ;;  %1811 = vmatpush.msrb.mxu3 %v1056_v36  ;;  %v816_v52 = vld [vmem:[%s2450_s29 + $0x6b8] sm:$0xff]  ;;  %v597_v36 = vld [vmem:[#allocation2 + $0x8] sm:$0xff] }
 0x16f   : > { %1698 = vmatpush.msra.mxu1 %v743_v24  ;;  %1751 = vmatpush.msrb.mxu0 %v672_v37  ;;  %v1361_v46 = vpop.f32.mrf.mxu0  ;;  %v648_v53 = vld [vmem:[%s2450_s29 + $0x178] sm:$0xff] }
 0x170   : > { %1793 = vmatpush.msrb.mxu2 %v912_v39  ;;  %1812 = vmatpush.msrb.mxu3 %v1048_v40  ;;  %v888_v56 = vld [vmem:[%s2450_s29 + $0x8f8] sm:$0xff] }
 0x171   : > { %1699 = vmatpush.msra.mxu1 %v735_v28  ;;  %1752 = vmatpush.msrb.mxu0 %v664_v41  ;;  %v1381_v50 = vpop.f32.mrf.mxu1  ;;  %v1024_v57 = vld [vmem:[%s2450_s29 + $0xd38] sm:$0xff] }
 0x172   : > { %1794 = vmatpush.msrb.mxu2 %v904_v43  ;;  %1813 = vmatpush.msrb.mxu3 %v1040_v44  ;;  %v1382_v55 = vadd.f32 %v1381_v50, %v1361_v46  ;;  %v808_v60 = vld [vmem:[%s2450_s29 + $0x678] sm:$0xff]  ;;  %v598_v44 = vld [vmem:[#allocation2 + $0x20] sm:$0xff] }
 0x173   : > { %1764 = vmatpush.msrb.mxu1 %v856_v30  ;;  %1753 = vmatpush.msrb.mxu0 %v656_v45  ;;  %v640_v62 = vld [vmem:[%s2450_s29 + $0x138] sm:$0xff] }
 0x174   : > { %1795 = vmatpush.msrb.mxu2 %v896_v48  ;;  %1814 = vmatpush.msrb.mxu3 %v1032_v49  ;;  %v1402_v61 = vadd.f32 %v1401_v51, %v1382_v55  ;;  %v880_v63 = vld [vmem:[%s2450_s29 + $0x8b8] sm:$0xff] }
 0x175   : > { %1765 = vmatpush.msrb.mxu1 %v848_v34  ;;  %v1421_v58 = vpop.f32.mrf.mxu3  ;;  %1720 = vmatmul.f32.vlgmr.msra.gmra.mxu2 %v2629_v54  ;;  %v595_v0 = vld [vmem:[#allocation2 + $0x18] sm:$0xff] }
 0x176   : > { %1754 = vmatpush.msrb.mxu0 %v648_v53  ;;  %v800_v1 = vld [vmem:[%s2450_s29 + $0x638] sm:$0xff]  ;;  %1796 = vmatpush.msrb.mxu2 %v888_v56  ;;  %v1422_v3 = vadd.f32 %v1421_v58, %v1402_v61  ;;  %v599_v53 = vld [vmem:[#allocation2 + $0x28] sm:$0xff] }
 0x177   : > { %1766 = vmatpush.msrb.mxu1 %v840_v38  ;;  %1815 = vmatpush.msrb.mxu3 %v1024_v57  ;;  %v1016_v2 = vld [vmem:[%s2450_s29 + $0xcf8] sm:$0xff] }
 0x178   : > { %1740 = vmatmul.f32.vlgmr.msra.gmra.mxu3 %v2658_v17  ;;  %v792_v4 = vld [vmem:[%s2450_s29 + $0x5f8] sm:$0xff]  ;;  %1755 = vmatpush.msrb.mxu0 %v640_v62  ;;  %v1826_v6 = vadd.f32 %v1422_v3, %v595_v0 }
 0x179   : > { %1767 = vmatpush.msrb.mxu1 %v832_v42  ;;  %1797 = vmatpush.msrb.mxu2 %v880_v63  ;;  %v632_v5 = vld [vmem:[%s2450_s29 + $0xf8] sm:$0xff] }
 0x17a   : > { %1816 = vmatpush.msrb.mxu3 %v1016_v2  ;;  %v872_v7 = vld [vmem:[%s2450_s29 + $0x878] sm:$0xff]  ;;  %1680 = vmatmul.f32.vlgmr.msra.gmra.mxu0 %v2700_v59  ;;  %1834 = vst [vmem:[#allocation2 + $0x18] sm:$0xff] %v1826_v6 }
 0x17b   : > { %1768 = vmatpush.msrb.mxu1 %v824_v47  ;;  %v1008_v8 = vld [vmem:[%s2450_s29 + $0xcb8] sm:$0xff]  ;;  %1756 = vmatpush.msrb.mxu0 %v632_v5 }
 0x17c   : > { %v784_v9 = vld [vmem:[%s2450_s29 + $0x5b8] sm:$0xff]  ;;  %1700 = vmatmul.f32.vlgmr.msra.gmra.mxu1 %v2740_v18  ;;  %1798 = vmatpush.msrb.mxu2 %v872_v7 }
 0x17d   : > { %1769 = vmatpush.msrb.mxu1 %v816_v52  ;;  %v624_v10 = vld [vmem:[%s2450_s29 + $0xb8] sm:$0xff]  ;;  %1817 = vmatpush.msrb.mxu3 %v1008_v8 }
 0x17e   : > { %v864_v11 = vld [vmem:[%s2450_s29 + $0x838] sm:$0xff]  ;;  %1757 = vmatpush.msrb.mxu0 %v624_v10 }
 0x17f   : > { %1770 = vmatpush.msrb.mxu1 %v808_v60  ;;  %v1000_v12 = vld [vmem:[%s2450_s29 + $0xc78] sm:$0xff]  ;;  %1799 = vmatpush.msrb.mxu2 %v864_v11 }
 0x180   : > { %v776_v13 = vld [vmem:[%s2450_s29 + $0x578] sm:$0xff]  ;;  %1818 = vmatpush.msrb.mxu3 %v1000_v12  ;;  %1800 = vmatmul.f32.vlgmr.msrb.gmra.mxu2 %v2629_v54 }
 0x181   : > { %1771 = vmatpush.msrb.mxu1 %v800_v1  ;;  %v616_v14 = vld [vmem:[%s2450_s29 + $0x78] sm:$0xff] }
 0x182   : > { %v992_v15 = vld [vmem:[%s2450_s29 + $0xc38] sm:$0xff]  ;;  %1758 = vmatpush.msrb.mxu0 %v616_v14 }
 0x183   : > { %1772 = vmatpush.msrb.mxu1 %v792_v4  ;;  %v768_v16 = vld [vmem:[%s2450_s29 + $0x538] sm:$0xff]  ;;  %1819 = vmatpush.msrb.mxu3 %v992_v15 }
 0x184   : > { %v608_v19 = vld [vmem:[%s2450_s29 + $0x38] sm:$0xff]  ;;  %1820 = vmatmul.f32.vlgmr.msrb.gmra.mxu3 %v2658_v17 }
 0x185   : > { %1773 = vmatpush.msrb.mxu1 %v784_v9  ;;  %v760_v20 = vld [vmem:[%s2450_s29 + $0x4f8] sm:$0xff]  ;;  %1759 = vmatpush.msrb.mxu0 %v608_v19 }
 0x186   : > { %v752_v21 = vld [vmem:[%s2450_s29 + $0x4b8] sm:$0xff]  ;;  %1760 = vmatmul.f32.vlgmr.msrb.gmra.mxu0 %v2700_v59 }
 0x187   : > { %1774 = vmatpush.msrb.mxu1 %v776_v13  ;;  %v744_v22 = vld [vmem:[%s2450_s29 + $0x478] sm:$0xff] }
 0x188   : > { %v736_v23 = vld [vmem:[%s2450_s29 + $0x438] sm:$0xff] }
 0x189   : > { %1775 = vmatpush.msrb.mxu1 %v768_v16  ;;  %v600_v0 = vld [vmem:[#allocation2 + $0x38] sm:$0xff] }
 0x18b   : > { %1776 = vmatpush.msrb.mxu1 %v760_v20 }
 0x18d   : > { %1777 = vmatpush.msrb.mxu1 %v752_v21 }
 0x18f   : > { %1778 = vmatpush.msrb.mxu1 %v744_v22 }
 0x191   : > { %1779 = vmatpush.msrb.mxu1 %v736_v23 }
 0x192   : > { %1780 = vmatmul.f32.vlgmr.msrb.gmra.mxu1 %v2740_v18 }
 0x195   : > { %v1441_v54 = vpop.f32.mrf.mxu0  ;;  %v1461_v24 = vpop.f32.mrf.mxu1 }
 0x196   : > { %v1481_v25 = vpop.f32.mrf.mxu2  ;;  %v1462_v26 = vadd.f32 %v1461_v24, %v1441_v54 }
 0x197   : > { %v1501_v27 = vpop.f32.mrf.mxu3 }
 0x198   : > { %v1482_v28 = vadd.f32 %v1481_v25, %v1462_v26 }
 0x19a   : > { %v1502_v17 = vadd.f32 %v1501_v27, %v1482_v28 }
 0x19c   : > { %v1827_v30 = vadd.f32 %v1502_v17, %v596_v29 }
 0x19e   : > { %1835 = vst [vmem:[#allocation2 + $0x10] sm:$0xff] %v1827_v30 }
 0x1b9   : > { %v1521_v31 = vpop.f32.mrf.mxu0  ;;  %v1541_v32 = vpop.f32.mrf.mxu1 }
 0x1ba   : > { %v1542_v59 = vadd.f32 %v1541_v32, %v1521_v31  ;;  %v1561_v33 = vpop.f32.mrf.mxu2 }
 0x1bb   : > { %v1581_v35 = vpop.f32.mrf.mxu3 }
 0x1bc   : > { %v1562_v34 = vadd.f32 %v1561_v33, %v1542_v59 }
 0x1be   : > { %v1582_v37 = vadd.f32 %v1581_v35, %v1562_v34 }
 0x1c0   : > { %v1828_v38 = vadd.f32 %v1582_v37, %v597_v36 }
 0x1c2   : > { %1836 = vst [vmem:[#allocation2 + $0x8] sm:$0xff] %v1828_v38 }
 0x1dd   : > { %v1601_v18 = vpop.f32.mrf.mxu0  ;;  %v1621_v39 = vpop.f32.mrf.mxu1 }
 0x1de   : > { %v1622_v40 = vadd.f32 %v1621_v39, %v1601_v18  ;;  %v1641_v41 = vpop.f32.mrf.mxu2 }
 0x1df   : > { %v1661_v43 = vpop.f32.mrf.mxu3 }
 0x1e0   : > { %v1642_v42 = vadd.f32 %v1641_v41, %v1622_v40 }
 0x1e2   : > { %v1662_v45 = vadd.f32 %v1661_v43, %v1642_v42 }
 0x1e4   : > { %v1829_v46 = vadd.f32 %v1662_v45, %v598_v44 }
 0x1e6   : > { %1837 = vst [vmem:[#allocation2 + $0x20] sm:$0xff] %v1829_v46 }
 0x1f7   : > { %v1681_v47 = vpop.f32.mrf.mxu0 }
 0x1f8   : > { %v1721_v50 = vpop.f32.mrf.mxu2 }
 0x1f9   : > { %v1701_v48 = vpop.f32.mrf.mxu1 }
 0x1fa   : > { %v1702_v49 = vadd.f32 %v1701_v48, %v1681_v47 }
 0x1fb   : > { %v1741_v52 = vpop.f32.mrf.mxu3 }
 0x1fc   : > { %v1722_v51 = vadd.f32 %v1721_v50, %v1702_v49 }
 0x1fe   : > { %v1742_v55 = vadd.f32 %v1741_v52, %v1722_v51 }
 0x200   : > { %v1830_v56 = vadd.f32 %v1742_v55, %v599_v53 }
 0x202   : > { %1838 = vst [vmem:[#allocation2 + $0x28] sm:$0xff] %v1830_v56 }
 0x203   : > { %v1761_v57 = vpop.f32.mrf.mxu0  ;;  %v1801_v60 = vpop.f32.mrf.mxu2 }
 0x207   : > { %v1821_v62 = vpop.f32.mrf.mxu3 }
 0x20f   : > { %v1781_v58 = vpop.f32.mrf.mxu1 }
 0x210   : > { %v1782_v61 = vadd.f32 %v1781_v58, %v1761_v57 }
 0x212   : > { %v1802_v63 = vadd.f32 %v1801_v60, %v1782_v61 }
 0x214   : > { %v1822_v1 = vadd.f32 %v1821_v62, %v1802_v63  ;;  %1843 = sbr.rel (%p2045_p2) target bundleno = 703 (0x2bf), region = 52 }
 0x216   : > { %v1831_v2 = vadd.f32 %v1822_v1, %v600_v0 }
 0x218   : > { %1839 = vst [vmem:[#allocation2 + $0x38] sm:$0xff] %v1831_v2 }
 0x219   : > { %v1844_v3 = vld [vmem:[#allocation2 + $0x30] sm:$0xff]  ;;  %v1845_v4 = vld [vmem:[#allocation2] sm:$0xff]  ;;  %v1846_v5 = vld [vmem:[#allocation2 + $0x18] sm:$0xff] }
 0x21a   : > { %v1847_v6 = vld [vmem:[#allocation2 + $0x10] sm:$0xff]  ;;  %v1852_v7 = vld [vmem:[#allocation8] sm:$0xff]  ;;  %v1848_v12 = vld [vmem:[#allocation2 + $0x8] sm:$0xff] }
 0x21b   : > { %v1854_v8 = vperm.slane %v1852_v7, 0  ;;  %v1855_v9 = vperm.slane %v1852_v7, 1  ;;  %v1856_v10 = vperm.slane %v1852_v7, 2  ;;  %v1857_v11 = vperm.slane %v1852_v7, 3  ;;  %v1849_v21 = vld [vmem:[#allocation2 + $0x20] sm:$0xff]  ;;  %v1850_v26 = vld [vmem:[#allocation2 + $0x28] sm:$0xff] }
 0x21c   : > { %v1858_v13 = vperm.slane %v1852_v7, 4  ;;  %v1859_v14 = vperm.slane %v1852_v7, 5  ;;  %v1860_v22 = vperm.slane %v1852_v7, 6  ;;  %v1861_v27 = vperm.slane %v1852_v7, 7 }
 0x21d   : > { %v1870_v15 = vadd.f32 %v1854_v8, %v1844_v3  ;;  %v1871_v16 = vadd.f32 %v1855_v9, %v1845_v4  ;;  %v1872_v19 = vadd.f32 %v1856_v10, %v1846_v5  ;;  %v1873_v20 = vadd.f32 %v1857_v11, %v1847_v6 }
 0x21e   : > { %v1874_v23 = vadd.f32 %v1858_v13, %v1848_v12  ;;  %v1875_v28 = vadd.f32 %v1859_v14, %v1849_v21  ;;  %v1876_v31 = vadd.f32 %v1860_v22, %v1850_v26 }
 0x21f   : > { %v1878_v54 = vmul.f32 %v1870_v15, %v1870_v15  ;;  %v1879_v24 = vmul.f32 %v1871_v16, %v1871_v16  ;;  %v1880_v25 = vmul.f32 %v1872_v19, %v1872_v19  ;;  %v1881_v29 = vmul.f32 %v1873_v20, %v1873_v20  ;;  %v1851_v30 = vld [vmem:[#allocation2 + $0x38] sm:$0xff] }
 0x220   : > { %v1882_v32 = vmul.f32 %v1874_v23, %v1874_v23  ;;  %v1877_v33 = vadd.f32 %v1861_v27, %v1851_v30  ;;  %v1883_v34 = vmul.f32 %v1875_v28, %v1875_v28  ;;  %v1884_v36 = vmul.f32 %v1876_v31, %v1876_v31 }
 0x221   : > { %v1886_v17 = vadd.f32 %v1879_v24, %v1878_v54 }
 0x222   : > { %v1885_v38 = vmul.f32 %v1877_v33, %v1877_v33 }
 0x223   : > { %v1887_v59 = vadd.f32 %v1886_v17, %v1880_v25 }
 0x225   : > { %v1888_v35 = vadd.f32 %v1887_v59, %v1881_v29 }
 0x227   : > { %v1889_v37 = vadd.f32 %v1888_v35, %v1882_v32 }
 0x229   : > { %v1890_v18 = vadd.f32 %v1889_v37, %v1883_v34 }
 0x22b   : > { %v1891_v39 = vadd.f32 %v1890_v18, %v1884_v36 }
 0x22d   : > { %v1892_v40 = vadd.f32 %v1891_v39, %v1885_v38 }
 0x22f   : > { %1893 = vadd.xlane.f32.xlu0 %v1892_v40 }
 0x2a2   : > { %v1894_v41 = vpop.xlane.xlu0 %1893 }
 0x2a3   : > { %2137 = vrsqrt.f32 %v1894_v41  ;;  %vm1901_vm8 = vweird.f32 %v1894_v41 }
 0x2a9   : > { %v2138_v42 = vpop.eup %2137 }
 0x2aa   : > { %v1896_v43 = vmul.f32 %v2138_v42, %v1894_v41  ;;  %vm1902_vm7 = vweird.f32 %v2138_v42 }
 0x2ab   : > { %vm1903_vm9 = vmor %vm1901_vm8, %vm1902_vm7 }
 0x2ac   : > { %v1897_v44 = vmul.f32 %v2138_v42, %v1896_v43 }
 0x2ae   : > { %v1898_v45 = vmul.f32 0.5, %v1897_v44 }
 0x2b0   : > { %v1899_v46 = vsub.f32 1.5, %v1898_v45 }
 0x2b2   : > { %v1900_v47 = vmul.f32 %v2138_v42, %v1899_v46 }
 0x2b4   : > { %v1904_v48 = vsel %vm1903_vm9, %v2138_v42, %v1900_v47 }
 0x2b5   : > { %v1905_v49 = vmul.f32 %v1904_v48, %v1870_v15  ;;  %v1906_v50 = vmul.f32 %v1904_v48, %v1871_v16  ;;  %v1907_v51 = vmul.f32 %v1904_v48, %v1872_v19  ;;  %v1908_v52 = vmul.f32 %v1904_v48, %v1873_v20 }
 0x2b6   : > { %v1909_v53 = vmul.f32 %v1904_v48, %v1874_v23  ;;  %v1910_v55 = vmul.f32 %v1904_v48, %v1875_v28  ;;  %v1911_v56 = vmul.f32 %v1904_v48, %v1876_v31  ;;  %v1912_v57 = vmul.f32 %v1904_v48, %v1877_v33 }
 0x2b7   : > { %1913 = vst [vmem:[#allocation9] sm:$0xff] %v1905_v49 }
 0x2b8   : > { %1914 = vst [vmem:[#allocation9 + $0x8] sm:$0xff] %v1906_v50 }
 0x2b9   : > { %1915 = vst [vmem:[#allocation9 + $0x10] sm:$0xff] %v1907_v51 }
 0x2ba   : > { %1916 = vst [vmem:[#allocation9 + $0x18] sm:$0xff] %v1908_v52 }
 0x2bb   : > { %1917 = vst [vmem:[#allocation9 + $0x20] sm:$0xff] %v1909_v53 }
 0x2bc   : > { %1918 = vst [vmem:[#allocation9 + $0x28] sm:$0xff] %v1910_v55 }
 0x2bd   : > { %1919 = vst [vmem:[#allocation9 + $0x30] sm:$0xff] %v1911_v56 }
 0x2be   : > { %1920 = vst [vmem:[#allocation9 + $0x38] sm:$0xff] %v1912_v57 }
 0x2bf PF: > { %p2079_p3 = scmp.eq.s32.totalorder %s2378_s18, 3  ;;  %s1932_s25 = sshll.u32 %s3131_s3, 4  ;;  %s1933_s25 = int_to_ptr.hbm [resolvable:$true] %s1932_s25 }
 0x2c0   : > { %s2328_s22 = smov [#allocation9]  }
 0x2c1   : > { %s1930_s24 = sshll.u32 %s2328_s22, 4  ;;  %s1931_s24 = int_to_ptr.vmem [resolvable:$true] %s1930_s24 }
 0x2c2   : > { %2062 = dma.vmem_to_hbm [thread:$0]  (%p2079_p3), %s1931_s24, 1024, %s1933_s25, [#allocation5]  }
 0x2c3   : > { %2294 = dma.done.wait (%p2079_p3), [#allocation5], 1024  }
 0x2c4   : > { %2296 = vsyncadd (%p2079_p3), [#allocation5], 4294966272 }
 0x2c5 PF: > { %s20_s17 = sadd.s32 1, %s2319_s17   ;;  %s3142_s18 = sld [smem:[#allocation14_spill]] }
 0x2c6   : > { %p17_p4 = scmp.ge.s32.totalorder %s20_s17, 6   ;;  %s3143_s12 = smov %s2303_s13 }
 0x2c7   : > { %s3144_s13 = smov %s2307_s14  ;;  %s3145_s14 = smov %s2429_s20 }
 0x2c8   : > { %s3146_s15 = smov %s2315_s16  ;;  %19 = sbr.rel (!%p17_p4) target bundleno = 10 (0xa), region = 95 }
 0x2cb   : > { %s3147_s16 = smov %s3142_s18 }
 0x2cd   :  { %1946 = vsyncpa [#allocation4], 1 }
 0x2ce   :  { %1948 = vsyncpa [#allocation4 + $0x1], 1 }
 0x2cf   :  { %1949 = vsyncpa [#allocation7], 1 }
 0x2d0   :  { %1951 = vsyncpa [#allocation7 + $0x1], 1 }
 0x2d1   :  { %1952 = vsyncpa [#allocation5], 1 }
 0x2d2   :  { %1954 = vsyncpa [#allocation5 + $0x1], 1 }

</bundles_post_ra>
